<compile_context>
chip_gen: v7x
topology: tpu7x:2x2x1
jax: 0.10.0
libtpu: 0.0.40
codegen_flags: <defaults>
</compile_context>

<pallas_src>
import random

import jax
import jax.numpy as jnp
import numpy as np
from jax.experimental import pallas as pl
from jax.experimental.pallas import tpu as pltpu

C_IN, H, W = 128, 14, 14
C_OUT = 256
K = 3 * C_IN          # 384 contracted features (tap * channel)
M = W * H             # 196 spatial rows (row = a * 14 + b)
AP = W + 2            # 16 padded positions along the conv (a) axis


# ----------------------------- Pallas kernel ------------------------------ #
def _make_kernel(shift):
    # Start row of the circularly shifted copy of A inside the doubled scratch:
    # A_shift[r] = A[(r - 14*shift) % 196] = a_ref[lo + r]  (a_ref holds A twice).
    lo = (-14 * shift) % M

    def kernel(x_ref, w_ref, o_ref, a_ref):
        # x_ref : (224, 128) bf16  padded input, row = (a+1)*14 + b, lane = channel
        # w_ref : (384, 512) bf16  [W2*W1[:,p0] | W2*W1[:,p1]], row = dh*128 + c
        # o_ref : (196, 256) f32
        # a_ref : (392, 384) bf16  VMEM scratch: im2col operand A, stored twice
        for dh in range(3):                               # static unroll
            win = x_ref[pl.ds(14 * dh, M), :]              # (196, 128) tap-dh window
            a_ref[pl.ds(0, M), pl.ds(128 * dh, 128)] = win
            a_ref[pl.ds(M, M), pl.ds(128 * dh, 128)] = win
        a0 = a_ref[pl.ds(0, M), :]                         # A            (196, 384)
        a1 = a_ref[pl.ds(lo, M), :]                        # rolled A     (196, 384)
        o_ref[...] = (
            jnp.dot(a0, w_ref[:, pl.ds(0, C_OUT)],
                    preferred_element_type=jnp.float32)
            + jnp.dot(a1, w_ref[:, pl.ds(C_OUT, C_OUT)],
                      preferred_element_type=jnp.float32))

    return kernel


def _fused_matmul(x_op, w_op, shift):
    flops = 2 * (2 * M * K * C_OUT)                               # two (196,384)@(384,256)
    scratch_bytes = (2 * M * K) * 2 + 2 * (M * K) * 2             # write both copies + 2 reads
    bytes_accessed = (AP * H * C_IN) * 2 + (K * 2 * C_OUT) * 2 \
        + (M * C_OUT) * 4 + scratch_bytes
    return pl.pallas_call(
        _make_kernel(shift),
        out_shape=jax.ShapeDtypeStruct((M, C_OUT), jnp.float32),
        grid=(1,),
        in_specs=[
            pl.BlockSpec((AP * H, C_IN), lambda i: (0, 0)),
            pl.BlockSpec((K, 2 * C_OUT), lambda i: (0, 0)),
        ],
        out_specs=pl.BlockSpec((M, C_OUT), lambda i: (0, 0)),
        scratch_shapes=[pltpu.VMEM((2 * M, K), jnp.bfloat16)],
        compiler_params=pltpu.CompilerParams(
            dimension_semantics=("arbitrary",)),
        cost_estimate=pl.CostEstimate(
            flops=flops, transcendentals=0, bytes_accessed=bytes_accessed),
    )(x_op, w_op)


# --------------------------- operand construction -------------------------- #
def _build_operands(x, w1, w2, s):
    """Minimal layout glue: b-roll + transpose + pad for x; scale-folded weights."""
    # Activations: fold the shared b-roll onto x, put channels on the lane axis,
    # zero-pad the conv (a) axis, flatten to (224, 128) bf16.
    xr = jnp.roll(x[0], s, axis=1)                      # (c, b, a), b-roll folded
    xt = jnp.transpose(xr, (2, 1, 0))                   # (a, b, c)
    xp = jnp.pad(xt, ((1, 1), (0, 0), (0, 0)))          # (16, 14, 128)
    x_op = xp.astype(jnp.bfloat16).reshape(AP * H, C_IN)

    # Weights: fold the W1 per-output-channel scales into the conv weights and
    # lay both scaled copies side by side along lanes: (384, 512) bf16.
    wt = w2.reshape(C_OUT, K).T                          # (384, 256): [dh*128+c, i]
    if s == 1:
        scales = jnp.stack([w1[:, 0], w1[:, 1]], axis=0)     # (2, 256) = (s0, s1)
    else:
        scales = jnp.stack([w1[:, 1], w1[:, 0]], axis=0)
    w_op = (wt[:, None, :] * scales[None, :, :]).reshape(K, 2 * C_OUT)
    return x_op, w_op.astype(jnp.bfloat16)


def _postprocess(o):
    # (196, 256) row-major (a*14+b, i)  ->  (1, 256, 14, 14)
    return jnp.transpose(o.reshape(W, H, C_OUT), (2, 0, 1))[None]


# ------------------------------- forward ---------------------------------- #
def forward(x, w1, w2, shift):
    """x: (1, 128, 14, 14) f32 (NCHW). Returns (1, 256, 14, 14) f32."""
    s = int(shift)
    x_op, w_op = _build_operands(x, w1, w2, s)
    o = _fused_matmul(x_op, w_op, s)                    # (196, 256) f32
    return _postprocess(o)


def forward_emulated(x, w1, w2, shift):
    """XLA emulation using the exact same bf16-quantized operands as the kernel."""
    s = int(shift)
    x_op, w_op = _build_operands(x, w1, w2, s)
    xf = x_op.astype(jnp.float32)
    wf = w_op.astype(jnp.float32)
    a = jnp.concatenate([xf[14 * dh:14 * dh + M, :] for dh in range(3)], axis=1)
    hp = jax.lax.Precision.HIGHEST
    p0 = jnp.dot(a, wf[:, :C_OUT], precision=hp)
    p1 = jnp.dot(a, wf[:, C_OUT:], precision=hp)
    o = p0 + jnp.roll(p1, 14 * s, axis=0)
    return _postprocess(o)


# --------------------- pure-JAX reference (op-for-op) ---------------------- #
def reference_forward(x, w1, w2, shift):
    s = int(shift)
    hp = jax.lax.Precision.HIGHEST
    t3 = jnp.transpose(x, (0, 3, 1, 2))               # 'ikjl -> ilkj'
    t3 = t3.reshape(1, 1, 14, 1792)
    p = jnp.pad(t3, ((0, 0), (0, 0), (1, 1), (0, 0)))
    cols = jnp.stack([p[:, 0, kr:kr + 14, :] for kr in range(3)], axis=1)
    t3 = cols.reshape(1, 3, 14, 128, 14)              # unfold((3,1), pad=(1,0))
    t4 = jnp.einsum('lknjm,ikj->linm', t3, w2, precision=hp)
    t5 = jnp.einsum('kiml,ij->kimjl', t4, w1, precision=hp)
    t6 = t5.reshape(1, 256, 28, 14)
    t6 = jnp.roll(t6, s, axis=2)
    t6 = t6.reshape(1, 256, 14, 2, 14).sum(axis=3)
    t7 = jnp.roll(t6, s, axis=3)
    return t7


# --------------------------------- main ------------------------------------ #
if __name__ == "__main__":
    # deterministic stand-in for the module's `random.random()` shift choice
    random.seed(0)
    shift_module = (random.random() > 0.5) * 2 - 1    # -> +1 with seed 0

    key = jax.random.PRNGKey(0)
    kx, k1, k2 = jax.random.split(key, 3)
    x = jax.random.normal(kx, (1, C_IN, H, W), dtype=jnp.float32)
    w1 = jax.random.normal(k1, (C_OUT, 2), dtype=jnp.float32)
    w2 = jax.random.normal(k2, (C_OUT, 3, C_IN), dtype=jnp.float32)

    fwd = jax.jit(forward, static_argnums=3)
    emul = jax.jit(forward_emulated, static_argnums=3)

    # Exercise BOTH roll directions (the module draws either at construction).
    for s in (int(shift_module), -int(shift_module)):
        y = jax.block_until_ready(fwd(x, w1, w2, s))
        assert y.shape == (1, C_OUT, H, W)

        # (1) Tight check vs an XLA emulation built from the exact same bf16
        #     operands: verifies the Pallas kernel / MXU path itself.
        y_emul = emul(x, w1, w2, s)
        np.testing.assert_allclose(np.asarray(y), np.asarray(y_emul),
                                   rtol=1e-3, atol=1e-2)

        # (2) Spec check vs the op-for-op f32 reference of the PyTorch module.
        #     Tolerance sized for bf16 operand quantization over the K=384
        #     contractions (error ~0.1 absolute; output std ~28; any indexing /
        #     roll-direction bug would show errors of magnitude ~30).
        y_ref = reference_forward(x, w1, w2, s)
        np.testing.assert_allclose(np.asarray(y), np.asarray(y_ref),
                                   rtol=2e-2, atol=1.0)

    print("KERNEL_OK")
</pallas_src>

<mosaic_0001>
module attributes {stable_mosaic.version = 11 : i64} {
  func.func @kernel(%arg0: i32, %arg1: memref<224x128xbf16, #tpu.memory_space<vmem>>, %arg2: memref<384x512xbf16, #tpu.memory_space<vmem>>, %arg3: memref<196x256xf32, #tpu.memory_space<vmem>>, %arg4: memref<392x384xbf16, #tpu.memory_space<vmem>>) attributes {dimension_semantics = [#tpu.dimension_semantics<arbitrary>], iteration_bounds = array<i64: 1>, scalar_prefetch = 0 : i64, scratch_operands = 1 : i64, tpu.core_type = #tpu.core_type<tc>, window_params = [{pipeline_mode = #tpu.pipeline_mode<synchronous>, transform_indices = @transform_0, window_bounds = array<i64: 224, 128>}, {pipeline_mode = #tpu.pipeline_mode<synchronous>, transform_indices = @transform_1, window_bounds = array<i64: 384, 512>}, {pipeline_mode = #tpu.pipeline_mode<synchronous>, transform_indices = @transform_2, window_bounds = array<i64: 196, 256>}]} {
    %c0 = arith.constant 0 : index
    %c0_0 = arith.constant 0 : index
    %0 = vector.load %arg1[%c0, %c0_0] : memref<224x128xbf16, #tpu.memory_space<vmem>>, vector<196x128xbf16>
    %c0_1 = arith.constant 0 : index
    %c0_2 = arith.constant 0 : index
    %1 = vector.load %arg4[%c0_1, %c0_2] : memref<392x384xbf16, #tpu.memory_space<vmem>>, vector<196x128xbf16>
    tpu.vector_store %arg4[%c0_1, %c0_2], %0 {strides = array<i32>} : memref<392x384xbf16, #tpu.memory_space<vmem>>, vector<196x128xbf16>,
    %c196 = arith.constant 196 : index
    %c0_3 = arith.constant 0 : index
    %2 = vector.load %arg4[%c196, %c0_3] : memref<392x384xbf16, #tpu.memory_space<vmem>>, vector<196x128xbf16>
    tpu.vector_store %arg4[%c196, %c0_3], %0 {strides = array<i32>} : memref<392x384xbf16, #tpu.memory_space<vmem>>, vector<196x128xbf16>,
    %c14 = arith.constant 14 : index
    %c0_4 = arith.constant 0 : index
    %3 = vector.load %arg1[%c14, %c0_4] : memref<224x128xbf16, #tpu.memory_space<vmem>>, vector<196x128xbf16>
    %c0_5 = arith.constant 0 : index
    %c128 = arith.constant 128 : index
    %4 = vector.load %arg4[%c0_5, %c128] : memref<392x384xbf16, #tpu.memory_space<vmem>>, vector<196x128xbf16>
    tpu.vector_store %arg4[%c0_5, %c128], %3 {strides = array<i32>} : memref<392x384xbf16, #tpu.memory_space<vmem>>, vector<196x128xbf16>,
    %c196_6 = arith.constant 196 : index
    %c128_7 = arith.constant 128 : index
    %5 = vector.load %arg4[%c196_6, %c128_7] : memref<392x384xbf16, #tpu.memory_space<vmem>>, vector<196x128xbf16>
    tpu.vector_store %arg4[%c196_6, %c128_7], %3 {strides = array<i32>} : memref<392x384xbf16, #tpu.memory_space<vmem>>, vector<196x128xbf16>,
    %c28 = arith.constant 28 : index
    %c0_8 = arith.constant 0 : index
    %6 = vector.load %arg1[%c28, %c0_8] : memref<224x128xbf16, #tpu.memory_space<vmem>>, vector<196x128xbf16>
    %c0_9 = arith.constant 0 : index
    %c256 = arith.constant 256 : index
    %7 = vector.load %arg4[%c0_9, %c256] : memref<392x384xbf16, #tpu.memory_space<vmem>>, vector<196x128xbf16>
    tpu.vector_store %arg4[%c0_9, %c256], %6 {strides = array<i32>} : memref<392x384xbf16, #tpu.memory_space<vmem>>, vector<196x128xbf16>,
    %c196_10 = arith.constant 196 : index
    %c256_11 = arith.constant 256 : index
    %8 = vector.load %arg4[%c196_10, %c256_11] : memref<392x384xbf16, #tpu.memory_space<vmem>>, vector<196x128xbf16>
    tpu.vector_store %arg4[%c196_10, %c256_11], %6 {strides = array<i32>} : memref<392x384xbf16, #tpu.memory_space<vmem>>, vector<196x128xbf16>,
    %c0_12 = arith.constant 0 : index
    %c0_13 = arith.constant 0 : index
    %9 = vector.load %arg4[%c0_12, %c0_13] : memref<392x384xbf16, #tpu.memory_space<vmem>>, vector<196x384xbf16>
    %c182 = arith.constant 182 : index
    %c0_14 = arith.constant 0 : index
    %10 = vector.load %arg4[%c182, %c0_14] : memref<392x384xbf16, #tpu.memory_space<vmem>>, vector<196x384xbf16>
    %c0_15 = arith.constant 0 : index
    %c0_16 = arith.constant 0 : index
    %11 = vector.load %arg2[%c0_15, %c0_16] : memref<384x512xbf16, #tpu.memory_space<vmem>>, vector<384x256xbf16>
    %cst = arith.constant dense<0.000000e+00> : vector<196x256xf32>
    %12 = tpu.matmul %9, %11, %cst {dimension_numbers = #tpu.dot_dimension_numbers<[1], [0], [0], [1], [0, 0, 1, 1], [], []>} : vector<196x384xbf16>, vector<384x256xbf16>, vector<196x256xf32> -> vector<196x256xf32>
    %c0_17 = arith.constant 0 : index
    %c256_18 = arith.constant 256 : index
    %13 = vector.load %arg2[%c0_17, %c256_18] : memref<384x512xbf16, #tpu.memory_space<vmem>>, vector<384x256xbf16>
    %cst_19 = arith.constant dense<0.000000e+00> : vector<196x256xf32>
    %14 = tpu.matmul %10, %13, %cst_19 {dimension_numbers = #tpu.dot_dimension_numbers<[1], [0], [0], [1], [0, 0, 1, 1], [], []>} : vector<196x384xbf16>, vector<384x256xbf16>, vector<196x256xf32> -> vector<196x256xf32>
    %15 = arith.addf %12, %14 : vector<196x256xf32>
    %c0_20 = arith.constant 0 : index
    %c0_21 = arith.constant 0 : index
    %16 = vector.load %arg3[%c0_20, %c0_21] : memref<196x256xf32, #tpu.memory_space<vmem>>, vector<196x256xf32>
    tpu.vector_store %arg3[%c0_20, %c0_21], %15 {strides = array<i32>} : memref<196x256xf32, #tpu.memory_space<vmem>>, vector<196x256xf32>,
    return
  }
  func.func @transform_0(%arg0: i32) -> (i32, i32) {
    %c0_i32 = arith.constant 0 : i32
    %c0_i32_0 = arith.constant 0 : i32
    %c0_i32_1 = arith.constant 0 : i32
    return %c0_i32, %c0_i32_0 : i32, i32
  }
  func.func @transform_1(%arg0: i32) -> (i32, i32) {
    %c0_i32 = arith.constant 0 : i32
    %c0_i32_0 = arith.constant 0 : i32
    %c0_i32_1 = arith.constant 0 : i32
    return %c0_i32, %c0_i32_0 : i32, i32
  }
  func.func @transform_2(%arg0: i32) -> (i32, i32) {
    %c0_i32 = arith.constant 0 : i32
    %c0_i32_0 = arith.constant 0 : i32
    %c0_i32_1 = arith.constant 0 : i32
    return %c0_i32, %c0_i32_0 : i32, i32
  }
}

</mosaic_0001>

<bundles_post_ra>
// kernel: forward.1
= control target key start
LH: loop header
LB: loop body
LE: loop exit
PB: predicated region body
PF: predicated region fallthrough
CT: control target
= control target key end

     0   :  { %v4761_v1 = vmov 0   ;;  %vm87_vm0 = vcmask 1041408   ;;  %vm88_vm1 = vcmask 1045508   ;;  %vm1087_vm3 = vcmask 1044480   ;;  %s4751_s1 = inlined_call_operand.vmem [shape: bf16[384,512], index: 1, kind: input, shape index: {}]   ;;  %s4752_s0 = inlined_call_operand.vmem [shape: bf16[224,128], index: 0, kind: input, shape index: {}]   ;;  %s4753_s2 = inlined_call_operand.vmem [shape: f32[196,256], index: 2, kind: output, shape index: {}]  }
   0x1   :  { %v2924_v0 = vld [vmem:[%s4751_s1 + $0xc] ss:$16 sps:$4 sm:$0xff]   ;;  %1635 = vmatprep.mubr.bf16.mxu0 %v4761_v1  ;;  %v2928_v3 = vld [vmem:[%s4751_s1 + $0x8] ss:$16 sps:$4 sm:$0xff]   ;;  %v3290_v31 = vld [vmem:[%s4752_s0 + $0x10] sm:$0xf] }
   0x2   :  { %v2926_v2 = vld [vmem:[%s4751_s1 + $0x20c] ss:$16 sps:$4 sm:$0xff]   ;;  %1442 = vmatprep.subr.bf16.mxu1 %v2924_v0  ;;  %v2929_v4 = vld [vmem:[%s4751_s1 + $0x208] ss:$16 sps:$4 sm:$0xff]   ;;  %v3295_v32 = vld [vmem:[%s4752_s0 + $0x64] sm:$0xf] }
   0x3   :  { %1603 = vmatprep.subr.bf16.mxu0 %v2926_v2  ;;  %v2930_v5 = vld [vmem:[%s4751_s1 + $0x2c] ss:$16 sps:$4 sm:$0xff]   ;;  %1443 = vmatpush1.bf16.msra.mxu1 %v2928_v3  ;;  %v2934_v7 = vld [vmem:[%s4751_s1 + $0x28] ss:$16 sps:$4 sm:$0xff]   ;;  %4775 = vst [vmem:[#allocation3_spill] sm:$0xff] %v3295_v32  ;;  %v4755_v36 = vrot.slane %v3295_v32, 6  ;;  %vm3312_vm2 = vmor %vm87_vm0, %vm88_vm1 }
   0x4   :  { %1604 = vmatpush1.bf16.msra.mxu0 %v2929_v4  ;;  %v2932_v6 = vld [vmem:[%s4751_s1 + $0x22c] ss:$16 sps:$4 sm:$0xff]   ;;  %1444 = vmatprep.subr.bf16.mxu1 %v2930_v5  ;;  %v2935_v8 = vld [vmem:[%s4751_s1 + $0x228] ss:$16 sps:$4 sm:$0xff]   ;;  %698 = vst [vmem:[#allocation2 + $0x134] sm:$0xf] %v3290_v31 }
   0x5   :  { %1605 = vmatprep.subr.bf16.mxu0 %v2932_v6  ;;  %v2936_v9 = vld [vmem:[%s4751_s1 + $0x4c] ss:$16 sps:$4 sm:$0xff]   ;;  %v2940_v11 = vld [vmem:[%s4751_s1 + $0x48] ss:$16 sps:$4 sm:$0xff]   ;;  %719 = vst [vmem:[#allocation2 + $0x230] sm:$0xf] %v3295_v32 }
   0x6   :  { %v2938_v10 = vld [vmem:[%s4751_s1 + $0x24c] ss:$16 sps:$4 sm:$0xff]   ;;  %v2941_v12 = vld [vmem:[%s4751_s1 + $0x248] ss:$16 sps:$4 sm:$0xff]   ;;  %v640_v40 = vrot.slane %v4755_v36, 4  ;;  %vm394_vm4 = vcmask 1042432  }
   0x7   :  { %1445 = vmatpush1.bf16.msra.mxu1 %v2934_v7  ;;  %v2942_v13 = vld [vmem:[%s4751_s1 + $0x6c] ss:$16 sps:$4 sm:$0xff]   ;;  %v2946_v15 = vld [vmem:[%s4751_s1 + $0x68] ss:$16 sps:$4 sm:$0xff]   ;;  %v2978_v48 = vld [vmem:[%s4751_s1 + $0x4] ss:$16 sps:$4 sm:$0xff]  }
   0x8   :  { %1606 = vmatpush1.bf16.msra.mxu0 %v2935_v8  ;;  %1446 = vmatprep.subr.bf16.mxu1 %v2936_v9  ;;  %v2944_v14 = vld [vmem:[%s4751_s1 + $0x26c] ss:$16 sps:$4 sm:$0xff]   ;;  %v2947_v16 = vld [vmem:[%s4751_s1 + $0x268] ss:$16 sps:$4 sm:$0xff]   ;;  %v3337_v49 = vld [vmem:[%s4752_s0 + $0x14] sm:$0xf] }
   0x9   :  { %1607 = vmatprep.subr.bf16.mxu0 %v2938_v10  ;;  %v2948_v17 = vld [vmem:[%s4751_s1 + $0x8c] ss:$16 sps:$4 sm:$0xff]   ;;  %v2952_v19 = vld [vmem:[%s4751_s1 + $0x88] ss:$16 sps:$4 sm:$0xff]   ;;  %4778 = vst [vmem:[#allocation4_spill] sm:$0xff] %v3337_v49  ;;  %vm395_vm5 = vcmask 1046532  }
   0xa   :  { %v2950_v18 = vld [vmem:[%s4751_s1 + $0x28c] ss:$16 sps:$4 sm:$0xff]   ;;  %v2953_v20 = vld [vmem:[%s4751_s1 + $0x288] ss:$16 sps:$4 sm:$0xff]   ;;  %699 = vst [vmem:[#allocation2 + $0x140] sm:$0xf] %v3337_v49  ;;  %vm3501_vm8 = vmor %vm394_vm4, %vm395_vm5 }
   0xb   :  { %1447 = vmatpush1.bf16.msra.mxu1 %v2940_v11  ;;  %v2954_v21 = vld [vmem:[%s4751_s1 + $0xac] ss:$16 sps:$4 sm:$0xff]   ;;  %v2958_v23 = vld [vmem:[%s4751_s1 + $0xa8] ss:$16 sps:$4 sm:$0xff]   ;;  %v2976_v60 = vld [vmem:[%s4751_s1] ss:$16 sps:$4 sm:$0xff]  }
   0xc   :  { %1608 = vmatpush1.bf16.msra.mxu0 %v2941_v12  ;;  %1448 = vmatprep.subr.bf16.mxu1 %v2942_v13  ;;  %v2956_v22 = vld [vmem:[%s4751_s1 + $0x2ac] ss:$16 sps:$4 sm:$0xff]   ;;  %v2959_v24 = vld [vmem:[%s4751_s1 + $0x2a8] ss:$16 sps:$4 sm:$0xff]   ;;  %v528_v61 = vld [vmem:[%s4752_s0 + $0x20] sm:$0xf] }
   0xd   :  { %1609 = vmatprep.subr.bf16.mxu0 %v2944_v14  ;;  %v2960_v25 = vld [vmem:[%s4751_s1 + $0xcc] ss:$16 sps:$4 sm:$0xff]   ;;  %v2964_v27 = vld [vmem:[%s4751_s1 + $0xc8] ss:$16 sps:$4 sm:$0xff]   ;;  %v2985_v63 = vld [vmem:[%s4751_s1 + $0x24] ss:$16 sps:$4 sm:$0xff]  }
   0xe   :  { %v2962_v26 = vld [vmem:[%s4751_s1 + $0x2cc] ss:$16 sps:$4 sm:$0xff]   ;;  %v2965_v28 = vld [vmem:[%s4751_s1 + $0x2c8] ss:$16 sps:$4 sm:$0xff]   ;;  %v587_v0 = vrot.slane %v528_v61, 6  ;;  %vm265_vm6 = vcmask 1040384  }
   0xf   :  { %1449 = vmatpush1.bf16.msra.mxu1 %v2946_v15  ;;  %v3282_v29 = vld [vmem:[%s4752_s0 + $0xc] sm:$0xc]  ;;  %v546_v33 = vld [vmem:[%s4752_s0 + $0x68] sm:$0xf]  ;;  %v3342_v50 = vld [vmem:[%s4752_s0 + $0x18] sm:$0xf] }
  0x10   :  { %1610 = vmatpush1.bf16.msra.mxu0 %v2947_v16  ;;  %1450 = vmatprep.subr.bf16.mxu1 %v2948_v17  ;;  %v2966_v30 = vld [vmem:[%s4751_s1 + $0xec] ss:$16 sps:$4 sm:$0xff]   ;;  %697 = vst [vmem:[#allocation2 + $0x128] sm:$0xc] %v3282_v29  ;;  %v641_v37 = vrot.slane %v546_v33, 6  ;;  %4779 = vst [vmem:[#allocation5_spill] sm:$0xff] %v3342_v50 }
  0x11   :  { %1611 = vmatprep.subr.bf16.mxu0 %v2950_v18  ;;  %v2968_v34 = vld [vmem:[%s4751_s1 + $0x2ec] ss:$16 sps:$4 sm:$0xff]   ;;  %720 = vst [vmem:[#allocation2 + $0x23c] sm:$0xf] %v546_v33  ;;  %v2970_v42 = vld [vmem:[%s4751_s1 + $0xe8] ss:$16 sps:$4 sm:$0xff]  }
  0x12   :  { %v547_v35 = vld [vmem:[%s4752_s0 + $0x6c] sm:$0xf]  ;;  %v643_v41 = vrot.slane %v641_v37, 4  ;;  %v2971_v44 = vld [vmem:[%s4751_s1 + $0x2e8] ss:$16 sps:$4 sm:$0xff]   ;;  %v642_v45 = vsel %vm3312_vm2, %v640_v40, %v641_v37  ;;  %v589_v12 = vrot.slane %v587_v0, 4 }
  0x13   :  { %1451 = vmatpush1.bf16.msra.mxu1 %v2952_v19  ;;  %v644_v39 = vrot.slane %v547_v35, 6  ;;  %v2972_v47 = vld [vmem:[%s4751_s1 + $0x10c] ss:$16 sps:$4 sm:$0xff]   ;;  %694 = vst [vmem:[#allocation2 + $0x110] sm:$0xf] %v642_v45  ;;  %vm266_vm7 = vcmask 1044484  }
  0x14   :  { %1612 = vmatpush1.bf16.msra.mxu0 %v2953_v20  ;;  %1452 = vmatprep.subr.bf16.mxu1 %v2954_v21  ;;  %v2979_v51 = vld [vmem:[%s4751_s1 + $0x108] ss:$16 sps:$4 sm:$0xff]   ;;  %700 = vst [vmem:[#allocation2 + $0x14c] sm:$0xf] %v3342_v50  ;;  %v2980_v52 = vld [vmem:[%s4751_s1 + $0x12c] ss:$16 sps:$4 sm:$0xff]   ;;  %vm3537_vm9 = vmor %vm265_vm6, %vm266_vm7 }
  0x15   :  { %1613 = vmatprep.subr.bf16.mxu0 %v2956_v22  ;;  %v646_v43 = vrot.slane %v644_v39, 4  ;;  %v645_v46 = vsel %vm3312_vm2, %v643_v41, %v644_v39  ;;  %v2982_v53 = vld [vmem:[%s4751_s1 + $0x128] ss:$16 sps:$4 sm:$0xff]   ;;  %v2986_v54 = vld [vmem:[%s4751_s1 + $0x14c] ss:$16 sps:$4 sm:$0xff]  }
  0x16   :  { %695 = vst [vmem:[#allocation2 + $0x11c] sm:$0xf] %v645_v46  ;;  %v3361_v55 = vld [vmem:[%s4752_s0 + $0x1c] sm:$0xf]  ;;  %702 = vst [vmem:[#allocation2 + $0x164] sm:$0xf] %v528_v61 }
  0x17   :  { %1453 = vmatpush1.bf16.msra.mxu1 %v2958_v23  ;;  %696 = vst [vmem:[#allocation2 + $0x128] sm:$0x3] %v646_v43  ;;  %4780 = vst [vmem:[#allocation6_spill] sm:$0xff] %v3361_v55  ;;  %v4754_v62 = vrot.slane %v3361_v55, 6  ;;  %v2989_v5 = vld [vmem:[%s4751_s1 + $0x148] ss:$16 sps:$4 sm:$0xff]  }
  0x18   :  { %1614 = vmatpush1.bf16.msra.mxu0 %v2959_v24  ;;  %1454 = vmatprep.subr.bf16.mxu1 %v2960_v25  ;;  %701 = vst [vmem:[#allocation2 + $0x158] sm:$0xf] %v3361_v55  ;;  %v2983_v8 = vld [vmem:[%s4751_s1 + $0x20] ss:$16 sps:$4 sm:$0xff]   ;;  %v2990_v9 = vld [vmem:[%s4751_s1 + $0x16c] ss:$16 sps:$4 sm:$0xff]  }
  0x19   :  { %1615 = vmatprep.subr.bf16.mxu0 %v2962_v26  ;;  %v586_v6 = vrot.slane %v4754_v62, 4  ;;  %v2992_v11 = vld [vmem:[%s4751_s1 + $0x168] ss:$16 sps:$4 sm:$0xff]   ;;  %v529_v14 = vld [vmem:[%s4752_s0 + $0x24] sm:$0xf] }
  0x1a   :  { %v773_v57 = vld [vmem:[#allocation2 + $0x110] sm:$0x8]  ;;  %v3401_v15 = vld [vmem:[%s4752_s0 + $0x28] sm:$0xf]  ;;  %v2995_v16 = vld [vmem:[%s4751_s1 + $0x44] ss:$16 sps:$4 sm:$0xff]  }
  0x1b   :  { %1455 = vmatpush1.bf16.msra.mxu1 %v2964_v27  ;;  %v3374_v4 = vld [vmem:[#allocation2 + $0x140] ss:$12 sps:$4 sm:$0xff]   ;;  %v588_v13 = vsel %vm3312_vm2, %v586_v6, %v587_v0  ;;  %v590_v17 = vrot.slane %v529_v14, 6  ;;  %703 = vst [vmem:[#allocation2 + $0x170] sm:$0xf] %v529_v14  ;;  %v4757_v23 = vrot.slane %v3401_v15, 6 }
  0x1c   :  { %1616 = vmatpush1.bf16.msra.mxu0 %v2965_v28  ;;  %1456 = vmatprep.subr.bf16.mxu1 %v2966_v30  ;;  %v1101_v10 = vrot.slane %v3374_v4, 3  ;;  %676 = vst [vmem:[#allocation2 + $0x38] sm:$0xf] %v588_v13  ;;  %704 = vst [vmem:[#allocation2 + $0x17c] sm:$0xf] %v3401_v15 }
  0x1d   :  { %1617 = vmatprep.subr.bf16.mxu0 %v2968_v34  ;;  %v769_v56 = vld [vmem:[#allocation2 + $0x11c] sm:$0xf]  ;;  %v2993_v18 = vld [vmem:[%s4751_s1 + $0x40] ss:$16 sps:$4 sm:$0xff]   ;;  %v2999_v20 = vld [vmem:[%s4751_s1 + $0x188] ss:$16 sps:$4 sm:$0xff]   ;;  %v591_v21 = vsel %vm3312_vm2, %v589_v12, %v590_v17 }
  0x1e   :  { %v2583_v58 = vcombine.low %v773_v57, %v769_v56  ;;  %v2975_v59 = vld [vmem:[#allocation2 + $0x128] ss:$12 sps:$4 sm:$0xff]   ;;  %v2996_v19 = vld [vmem:[%s4751_s1 + $0x18c] ss:$16 sps:$4 sm:$0xff]   ;;  %v592_v22 = vrot.slane %v590_v17, 4 }
  0x1f   :  { %1457 = vmatpush1.bf16.msra.mxu1 %v2970_v42  ;;  %v1095_v3 = vrot.slane %v2975_v59, 3  ;;  %v3422_v25 = vld [vmem:[#allocation2 + $0x158] ss:$12 sps:$4 sm:$0xff]   ;;  %v3000_v26 = vld [vmem:[%s4751_s1 + $0x1ac] ss:$16 sps:$4 sm:$0xff]  }
  0x20   :  { %1618 = vmatpush1.bf16.msra.mxu0 %v2971_v44  ;;  %1458 = vmatprep.subr.bf16.mxu1 %v2972_v47  ;;  %v1094_v2 = vrot.slane %v2583_v58, 3  ;;  %v3004_v27 = vld [vmem:[%s4751_s1 + $0x64] ss:$16 sps:$4 sm:$0xff]   ;;  %677 = vst [vmem:[#allocation2 + $0x44] sm:$0xf] %v591_v21  ;;  %v594_v34 = vsel %vm3312_vm2, %v592_v22, %v4757_v23  ;;  %v1107_v47 = vrot.slane %v3422_v25, 3 }
  0x21   :  { %2202 = vmatprep.subr.bf16.mxu0 %v2978_v48  ;;  %v1102_v24 = vsel %vm1087_vm3, %v1095_v3, %v1101_v10  ;;  %v12_v28 = vld [vmem:[%s4752_s0] sm:$0xf]  ;;  %v3436_v30 = vld [vmem:[%s4752_s0 + $0x4] sm:$0xf]  ;;  %v3441_v33 = vld [vmem:[%s4752_s0 + $0x58] sm:$0xf] }
  0x22   :  { %v1096_v7 = vsel %vm1087_vm3, %v1094_v2, %v1095_v3  ;;  %v3002_v35 = vld [vmem:[%s4751_s1 + $0x60] ss:$16 sps:$4 sm:$0xff]   ;;  %v35_v37 = vld [vmem:[%s4752_s0 + $0x5c] sm:$0xf]  ;;  %59 = vst [vmem:[#allocation2 + $0x108] sm:$0xf] %v3441_v33 }
  0x23   :  { %1459 = vmatpush1.bf16.msra.mxu1 %v2979_v51  ;;  %1636 = vmatmul.mubr.bf16.vlgmr.msra.gmra.mrb[0].mxu0 %v1096_v7  ;;  %v36_v39 = vld [vmem:[%s4752_s0 + $0x60] sm:$0x3]  ;;  %v90_v40 = vrot.slane %v12_v28, 6  ;;  %v92_v41 = vrot.slane %v3436_v30, 6  ;;  %37 = vst [vmem:[#allocation2] sm:$0xf] %v12_v28  ;;  %v1108_v7 = vsel %vm1087_vm3, %v1101_v10, %v1107_v47 }
  0x24   :  { %1460 = vmatprep.subr.bf16.mxu1 %v2980_v52  ;;  %2203 = vmatpush1.bf16.msra.mxu0 %v2976_v60  ;;  %38 = vst [vmem:[#allocation2 + $0xc] sm:$0xf] %v3436_v30  ;;  %678 = vst [vmem:[#allocation2 + $0x50] sm:$0xf] %v594_v34  ;;  %v3005_v42 = vld [vmem:[%s4751_s1 + $0x1a8] ss:$16 sps:$4 sm:$0xff]  }
  0x25   :  { %1645 = vmatprep.mubr.bf16.mxu0 %v4761_v1  ;;  %2204 = vmatprep.subr.bf16.mxu0 %v2985_v63  ;;  %v3012_v43 = vld [vmem:[%s4751_s1 + $0x84] ss:$16 sps:$4 sm:$0xff]   ;;  %60 = vst [vmem:[#allocation2 + $0x114] sm:$0xf] %v35_v37  ;;  %61 = vst [vmem:[#allocation2 + $0x120] sm:$0x3] %v36_v39 }
  0x26   :  { %v4758_v44 = vrot.slane %v3441_v33, 6  ;;  %v158_v45 = vrot.slane %v35_v37, 6  ;;  %v3469_v46 = vld [vmem:[%s4752_s0 + $0x4] sm:$0x8]  ;;  %v3006_v48 = vld [vmem:[%s4751_s1 + $0x1cc] ss:$16 sps:$4 sm:$0xff]  }
  0x27   :  { %1461 = vmatpush1.bf16.msra.mxu1 %v2982_v53  ;;  %188 = vst [vmem:[#allocation2 + $0x120] sm:$0xc] %v90_v40  ;;  %v3476_v51 = vld [vmem:[#allocation2 + $0x170] ss:$12 sps:$4 sm:$0xff]   ;;  %v91_v52 = vrot.slane %v90_v40, 4  ;;  %v2579_v56 = vrot.slane %v3469_v46, 9 }
  0x28   :  { %1462 = vmatprep.subr.bf16.mxu1 %v2986_v54  ;;  %2205 = vmatpush1.bf16.msra.mxu0 %v2983_v8  ;;  %v157_v53 = vrot.slane %v4758_v44, 4  ;;  %v3483_v54 = vld [vmem:[%s4752_s0 + $0x8] sm:$0xf]  ;;  %v3010_v57 = vld [vmem:[%s4751_s1 + $0x80] ss:$16 sps:$4 sm:$0xff]  }
  0x29   :  { %2206 = vmatprep.subr.bf16.mxu0 %v2995_v16  ;;  %v3492_v58 = vld [vmem:[%s4752_s0 + $0xc] sm:$0xf]  ;;  %v3497_v59 = vld [vmem:[%s4752_s0 + $0x5c] sm:$0xf]  ;;  %v399_v61 = vrot.slane %v3483_v54, 5  ;;  %v93_v0 = vsel %vm3312_vm2, %v91_v52, %v92_v41 }
  0x2a   :  { %4781 = vst [vmem:[#allocation7_spill] sm:$0xff] %v3497_v59  ;;  %v3009_v63 = vld [vmem:[%s4751_s1 + $0x1c8] ss:$16 sps:$4 sm:$0xff]   ;;  %v236_v2 = vld [vmem:[%s4752_s0 + $0x60] sm:$0xf]  ;;  %v159_v6 = vsel %vm3312_vm2, %v157_v53, %v158_v45  ;;  %v4756_v8 = vrot.slane %v3497_v59, 7 }
  0x2b   :  { %1463 = vmatpush1.bf16.msra.mxu1 %v2989_v5  ;;  %1646 = vmatmul.mubr.bf16.gmra.mrb[4].mxu0 %v1102_v24  ;;  %v237_v3 = vld [vmem:[%s4752_s0 + $0x64] sm:$0xf]  ;;  %v238_v5 = vld [vmem:[%s4752_s0 + $0x68] sm:$0x1]  ;;  %189 = vst [vmem:[#allocation2 + $0x12c] sm:$0xf] %v93_v0  ;;  %v400_v13 = vsel %vm3501_vm8, %v2579_v56, %v399_v61 }
  0x2c   :  { %1464 = vmatprep.subr.bf16.mxu1 %v2990_v9  ;;  %2207 = vmatpush1.bf16.msra.mxu0 %v2993_v18  ;;  %v336_v9 = vrot.slane %v236_v2, 7  ;;  %v3533_v12 = vld [vmem:[%s4752_s0 + $0x2c] sm:$0xf]  ;;  %211 = vst [vmem:[#allocation2 + $0x234] sm:$0xf] %v159_v6  ;;  %v342_v10 = vrot.slane %v238_v5, 7 }
  0x2d   :  { %1655 = vmatprep.mubr.bf16.mxu0 %v4761_v1  ;;  %2208 = vmatprep.subr.bf16.mxu0 %v3004_v27  ;;  %v401_v14 = vrot.slane %v399_v61, 4  ;;  %v402_v16 = vrot.slane %v3492_v58, 5  ;;  %v3547_v17 = vld [vmem:[%s4752_s0 + $0x30] sm:$0xf]  ;;  %705 = vst [vmem:[#allocation2 + $0x188] sm:$0xf] %v3533_v12 }
  0x2e   :  { %v338_v21 = vrot.slane %v336_v9, 4  ;;  %498 = vst [vmem:[#allocation2 + $0x124] sm:$0xc] %v400_v13  ;;  %706 = vst [vmem:[#allocation2 + $0x194] sm:$0xf] %v3547_v17  ;;  %v4759_v24 = vrot.slane %v3290_v31, 6 }
  0x2f   :  { %1465 = vmatpush1.bf16.msra.mxu1 %v2992_v11  ;;  %v339_v11 = vrot.slane %v237_v3, 7  ;;  %v3015_v27 = vld [vmem:[%s4751_s1 + $0x1e8] ss:$16 sps:$4 sm:$0xff]   ;;  %v403_v28 = vsel %vm3501_vm8, %v401_v14, %v402_v16  ;;  %v3022_v34 = vld [vmem:[%s4751_s1 + $0xa0] ss:$16 sps:$4 sm:$0xff]   ;;  %v404_v30 = vrot.slane %v402_v16, 4 }
  0x30   :  { %1466 = vmatprep.subr.bf16.mxu1 %v2996_v19  ;;  %2209 = vmatpush1.bf16.msra.mxu0 %v3002_v35  ;;  %v3013_v19 = vld [vmem:[%s4751_s1 + $0x1ec] ss:$16 sps:$4 sm:$0xff]   ;;  %v3024_v35 = vld [vmem:[%s4751_s1 + $0xa4] ss:$16 sps:$4 sm:$0xff]   ;;  %499 = vst [vmem:[#allocation2 + $0x130] sm:$0xf] %v403_v28 }
  0x31   :  { %2210 = vmatprep.subr.bf16.mxu0 %v3012_v43  ;;  %v341_v22 = vrot.slane %v339_v11, 4  ;;  %v340_v39 = vsel %vm3537_vm9, %v338_v21, %v339_v11  ;;  %v14_v43 = vld [vmem:[%s4752_s0 + $0x8] sm:$0xf]  ;;  %v15_v45 = vld [vmem:[%s4752_s0 + $0xc] sm:$0xf]  ;;  %v3630_v11 = vrot.slane %v4759_v24, 4 }
  0x32   :  { %392 = vst [vmem:[#allocation2 + $0x118] sm:$0xf] %v340_v39  ;;  %v95_v52 = vrot.slane %v14_v43, 6  ;;  %v98_v53 = vrot.slane %v15_v45, 6  ;;  %v3593_v56 = vld [vmem:[%s4752_s0 + $0x10] sm:$0xf] }
  0x33   :  { %1467 = vmatpush1.bf16.msra.mxu1 %v2999_v20  ;;  %v335_v20 = vrot.slane %v4756_v8, 4  ;;  %1656 = vmatmul.mubr.bf16.gmra.mrb[8].mxu0 %v1108_v7  ;;  %v343_v40 = vsel %vm3537_vm9, %v341_v22, %v342_v10  ;;  %39 = vst [vmem:[#allocation2 + $0x18] sm:$0xf] %v14_v43  ;;  %40 = vst [vmem:[#allocation2 + $0x24] sm:$0xf] %v15_v45 }
  0x34   :  { %1468 = vmatprep.subr.bf16.mxu1 %v3000_v26  ;;  %v1113_v26 = vrot.slane %v3476_v51, 3  ;;  %1665 = vmatprep.mubr.bf16.mxu0 %v4761_v1  ;;  %393 = vst [vmem:[#allocation2 + $0x124] sm:$0x3] %v343_v40  ;;  %v3030_v61 = vld [vmem:[%s4751_s1 + $0xc0] ss:$16 sps:$4 sm:$0xff]   ;;  %v97_v0 = vrot.slane %v95_v52, 4 }
  0x35   :  { %2211 = vmatpush1.bf16.msra.mxu0 %v3010_v57  ;;  %v337_v37 = vsel %vm3537_vm9, %v335_v20, %v336_v9  ;;  %v3598_v57 = vld [vmem:[%s4752_s0 + $0x14] sm:$0xf]  ;;  %v3625_v9 = vld [vmem:[%s4752_s0 + $0x38] sm:$0xf]  ;;  %v3035_v14 = vld [vmem:[%s4751_s1 + $0xe0] ss:$16 sps:$4 sm:$0xff]  }
  0x36   :  { %391 = vst [vmem:[#allocation2 + $0x10c] sm:$0xf] %v337_v37  ;;  %2212 = vmatprep.subr.bf16.mxu0 %v3024_v35  ;;  %v408_v58 = vrot.slane %v3598_v57, 5  ;;  %v3032_v2 = vld [vmem:[%s4751_s1 + $0xc4] ss:$16 sps:$4 sm:$0xff]   ;;  %v1114_v5 = vsel %vm1087_vm3, %v1107_v47, %v1113_v26  ;;  %v99_v10 = vsel %vm3312_vm2, %v97_v0, %v98_v53  ;;  %v100_v22 = vrot.slane %v98_v53, 4 }
  0x37   :  { %1469 = vmatpush1.bf16.msra.mxu1 %v3005_v42  ;;  %v3580_v42 = vld [vmem:[%s4751_s1 + $0x204] ss:$16 sps:$4 sm:$0xff]   ;;  %708 = vst [vmem:[#allocation2 + $0x1ac] sm:$0xf] %v3625_v9  ;;  %191 = vst [vmem:[#allocation2 + $0x144] sm:$0xf] %v99_v10 }
  0x38   :  { %1470 = vmatprep.subr.bf16.mxu1 %v3006_v48  ;;  %v94_v48 = vrot.slane %v92_v41, 4  ;;  %v405_v41 = vrot.slane %v3593_v56, 5  ;;  %v3613_v3 = vld [vmem:[%s4752_s0 + $0x34] sm:$0xf]  ;;  %v410_v37 = vrot.slane %v408_v58, 4 }
  0x39   :  { %2213 = vmatpush1.bf16.msra.mxu0 %v3022_v34  ;;  %707 = vst [vmem:[#allocation2 + $0x1a0] sm:$0xf] %v3613_v3  ;;  %v3633_v47 = vld [vmem:[#allocation2 + $0x188] ss:$12 sps:$4 sm:$0xff]   ;;  %v3659_v45 = vld [vmem:[#allocation2 + $0x120] ss:$12 sps:$4 sm:$0xff]  }
  0x3a   :  { %v406_v6 = vsel %vm3501_vm8, %v404_v30, %v405_v41  ;;  %v407_v7 = vrot.slane %v405_v41, 4  ;;  %2214 = vmatprep.subr.bf16.mxu0 %v3032_v2  ;;  %v3037_v16 = vld [vmem:[%s4751_s1 + $0xe4] ss:$16 sps:$4 sm:$0xff]   ;;  %v1119_v21 = vrot.slane %v3633_v47, 3  ;;  %v3025_v53 = vld [vmem:[%s4751_s1 + $0x200] ss:$16 sps:$4 sm:$0xff]  }
  0x3b   :  { %1471 = vmatpush1.bf16.msra.mxu1 %v3009_v63  ;;  %v96_v63 = vsel %vm3312_vm2, %v94_v48, %v95_v52  ;;  %500 = vst [vmem:[#allocation2 + $0x13c] sm:$0xf] %v406_v6  ;;  %v3653_v20 = vld [vmem:[%s4752_s0 + $0x14] sm:$0xf]  ;;  %1666 = vmatmul.mubr.bf16.gmra.mrb[12].mxu0 %v1114_v5  ;;  %v3017_v40 = vld [vmem:[#allocation2 + $0x124] ss:$12 sps:$4 sm:$0xff]  }
  0x3c   :  { %1472 = vmatprep.subr.bf16.mxu1 %v3013_v19  ;;  %190 = vst [vmem:[#allocation2 + $0x138] sm:$0xf] %v96_v63  ;;  %v409_v13 = vsel %vm3501_vm8, %v407_v7, %v408_v58  ;;  %v16_v19 = vld [vmem:[%s4752_s0 + $0x10] sm:$0xf]  ;;  %42 = vst [vmem:[#allocation2 + $0x3c] sm:$0xf] %v3653_v20  ;;  %1675 = vmatprep.mubr.bf16.mxu0 %v4761_v1  ;;  %v1120_v5 = vsel %vm1087_vm3, %v1113_v26, %v1119_v21 }
  0x3d   :  { %501 = vst [vmem:[#allocation2 + $0x148] sm:$0xf] %v409_v13  ;;  %41 = vst [vmem:[#allocation2 + $0x30] sm:$0xf] %v16_v19  ;;  %v768_v28 = vld [vmem:[#allocation2 + $0x114] sm:$0xff]  ;;  %2215 = vmatpush1.bf16.msra.mxu0 %v3030_v61  ;;  %v104_v35 = vrot.slane %v3653_v20, 6 }
  0x3e   :  { %v772_v34 = vld [vmem:[#allocation2 + $0x108] sm:$0x88]  ;;  %2216 = vmatprep.subr.bf16.mxu0 %v3037_v16  ;;  %v3666_v52 = vld [vmem:[%s4752_s0 + $0x18] sm:$0xf]  ;;  %v3674_v41 = vld [vmem:[%s4752_s0 + $0x1c] sm:$0xf] }
  0x3f   :  { %1473 = vmatpush1.bf16.msra.mxu1 %v3015_v27  ;;  %v101_v27 = vrot.slane %v16_v19, 6  ;;  %v2582_v39 = vcombine.high %v772_v34, %v768_v28  ;;  %v2581_v43 = vcombine.low %v772_v34, %v768_v28  ;;  %v411_v58 = vrot.slane %v3666_v52, 5  ;;  %v3042_v51 = vld [vmem:[%s4751_s1 + $0x224] ss:$16 sps:$4 sm:$0xff]   ;;  %v3040_v28 = vld [vmem:[%s4751_s1 + $0x220] ss:$16 sps:$4 sm:$0xff]  }
  0x40   :  { %2755 = vmatprep.subr.bf16.mxu1 %v3580_v42  ;;  %v1092_v63 = vrot.slane %v3017_v40, 3  ;;  %v1089_v2 = vrot.slane %v3659_v45, 3  ;;  %v3683_v6 = vld [vmem:[#allocation2 + $0x1a0] ss:$12 sps:$4 sm:$0xff]   ;;  %v414_v20 = vrot.slane %v3674_v41, 5  ;;  %v2578_v26 = vrot.slane %v3469_v46, 11 }
  0x41   :  { %v102_v48 = vsel %vm3312_vm2, %v100_v22, %v101_v27  ;;  %v103_v30 = vrot.slane %v101_v27, 4  ;;  %v1091_v61 = vrot.slane %v2582_v39, 3  ;;  %v1088_v0 = vrot.slane %v2581_v43, 3  ;;  %2217 = vmatpush1.bf16.msra.mxu0 %v3035_v14  ;;  %v3709_v46 = vld [vmem:[%s4752_s0 + $0x3c] sm:$0xf] }
  0x42   :  { %192 = vst [vmem:[#allocation2 + $0x150] sm:$0xf] %v102_v48  ;;  %v412_v10 = vsel %vm3501_vm8, %v410_v37, %v411_v58  ;;  %v413_v13 = vrot.slane %v411_v58, 4  ;;  %v1125_v14 = vrot.slane %v3683_v6, 3  ;;  %v3714_v37 = vld [vmem:[%s4752_s0 + $0x40] sm:$0xf] }
  0x43   :  { %v105_v7 = vsel %vm3312_vm2, %v103_v30, %v104_v35  ;;  %v1093_v16 = vsel %vm1087_vm3, %v1091_v61, %v1092_v63  ;;  %v1090_v19 = vsel %vm1087_vm3, %v1088_v0, %v1089_v2  ;;  %502 = vst [vmem:[#allocation2 + $0x154] sm:$0xf] %v412_v10  ;;  %v3698_v27 = vld [vmem:[#allocation2 + $0x138] ss:$12 sps:$4 sm:$0xff]   ;;  %1676 = vmatmul.mubr.bf16.gmra.mrb[16].mxu0 %v1120_v5  ;;  %v3045_v39 = vld [vmem:[%s4751_s1 + $0x100] ss:$16 sps:$4 sm:$0xff]  }
  0x44   :  { %193 = vst [vmem:[#allocation2 + $0x15c] sm:$0xf] %v105_v7  ;;  %1474 = vmatprep.mubr.bf16.mxu1 %v1093_v16  ;;  %v3696_v22 = vld [vmem:[#allocation2 + $0x13c] ss:$12 sps:$4 sm:$0xff]   ;;  %v415_v34 = vsel %vm3501_vm8, %v413_v13, %v414_v20  ;;  %1685 = vmatprep.mubr.bf16.mxu0 %v4761_v1  ;;  %v1097_v43 = vrot.slane %v3698_v27, 3  ;;  %v106_v30 = vrot.slane %v104_v35, 4 }
  0x45   :  { %1475 = vmatmul.mubr.bf16.vlgmr.msra.gmra.mrb[0].mxu1 %v1090_v19  ;;  %v1099_v40 = vrot.slane %v3696_v22, 3  ;;  %503 = vst [vmem:[#allocation2 + $0x160] sm:$0xf] %v415_v34  ;;  %709 = vst [vmem:[#allocation2 + $0x1b8] sm:$0xf] %v3709_v46  ;;  %v416_v10 = vrot.slane %v414_v20, 4  ;;  %v1126_v34 = vsel %vm1087_vm3, %v1119_v21, %v1125_v14 }
  0x46   :  { %2763 = vmatpush1.bf16.msra.mxu1 %v3025_v53  ;;  %710 = vst [vmem:[#allocation2 + $0x1c4] sm:$0xf] %v3714_v37  ;;  %v3047_v45 = vld [vmem:[%s4751_s1 + $0x104] ss:$16 sps:$4 sm:$0xff]   ;;  %v18_v48 = vld [vmem:[%s4752_s0 + $0x18] sm:$0xf] }
  0x47   :  { %2756 = vmatprep.subr.bf16.mxu1 %v3042_v51  ;;  %v19_v53 = vld [vmem:[%s4752_s0 + $0x1c] sm:$0xf]  ;;  %v107_v58 = vrot.slane %v18_v48, 6  ;;  %v3736_v61 = vld [vmem:[%s4752_s0 + $0x20] sm:$0xf]  ;;  %v1100_v0 = vsel %vm1087_vm3, %v1092_v63, %v1099_v40  ;;  %2218 = vmatprep.subr.bf16.mxu0 %v3047_v45  ;;  %v1098_v51 = vsel %vm1087_vm3, %v1089_v2, %v1097_v43 }
  0x48   :  { %43 = vst [vmem:[#allocation2 + $0x48] sm:$0xf] %v18_v48  ;;  %v110_v5 = vrot.slane %v19_v53, 6  ;;  %v3744_v7 = vld [vmem:[%s4752_s0 + $0x24] sm:$0xf]  ;;  %1484 = vmatprep.mubr.bf16.mxu1 %v1100_v0  ;;  %2219 = vmatpush1.bf16.msra.mxu0 %v3045_v39  ;;  %v417_v16 = vrot.slane %v3736_v61, 5 }
  0x49   :  { %44 = vst [vmem:[#allocation2 + $0x54] sm:$0xf] %v19_v53  ;;  %v3749_v35 = vld [vmem:[%s4752_s0 + $0x44] sm:$0xf]  ;;  %v108_v13 = vsel %vm3312_vm2, %v106_v30, %v107_v58  ;;  %v109_v63 = vrot.slane %v107_v58, 4  ;;  %v420_v19 = vrot.slane %v3744_v7, 5 }
  0x4a   :  { %v3758_v20 = vld [vmem:[%s4752_s0 + $0x48] sm:$0xf]  ;;  %711 = vst [vmem:[#allocation2 + $0x1d0] sm:$0xf] %v3749_v35  ;;  %2764 = vmatpush1.bf16.msra.mxu1 %v3040_v28  ;;  %194 = vst [vmem:[#allocation2 + $0x168] sm:$0xf] %v108_v13  ;;  %v418_v53 = vsel %vm3501_vm8, %v416_v10, %v417_v16 }
  0x4b   :  { %712 = vst [vmem:[#allocation2 + $0x1dc] sm:$0xf] %v3758_v20  ;;  %v3052_v39 = vld [vmem:[%s4751_s1 + $0x120] ss:$16 sps:$4 sm:$0xff]   ;;  %v112_v45 = vrot.slane %v110_v5, 4  ;;  %v270_v48 = vrot.slane %v3483_v54, 7  ;;  %v111_v2 = vsel %vm3312_vm2, %v109_v63, %v110_v5  ;;  %1686 = vmatmul.mubr.bf16.gmra.mrb[20].mxu0 %v1126_v34 }
  0x4c   :  { %v419_v47 = vrot.slane %v417_v16, 4  ;;  %v3054_v21 = vld [vmem:[%s4751_s1 + $0x124] ss:$16 sps:$4 sm:$0xff]   ;;  %v422_v28 = vrot.slane %v420_v19, 4  ;;  %195 = vst [vmem:[#allocation2 + $0x174] sm:$0xf] %v111_v2  ;;  %1695 = vmatprep.mubr.bf16.mxu0 %v4761_v1 }
  0x4d   :  { %504 = vst [vmem:[#allocation2 + $0x16c] sm:$0xf] %v418_v53  ;;  %v3055_v30 = vld [vmem:[%s4751_s1 + $0x240] ss:$16 sps:$4 sm:$0xff]   ;;  %v3787_v58 = vld [vmem:[%s4751_s1 + $0x244] ss:$16 sps:$4 sm:$0xff]   ;;  %v271_v5 = vsel %vm3537_vm9, %v2578_v26, %v270_v48  ;;  %1485 = vmatmul.mubr.bf16.gmra.mrb[4].mxu1 %v1098_v51  ;;  %2220 = vmatprep.subr.bf16.mxu0 %v3054_v21 }
  0x4e   :  { %v20_v0 = vld [vmem:[%s4752_s0 + $0x20] sm:$0xf]  ;;  %v3798_v13 = vld [vmem:[#allocation2 + $0x150] ss:$12 sps:$4 sm:$0xff]   ;;  %v421_v63 = vsel %vm3501_vm8, %v419_v47, %v420_v19  ;;  %369 = vst [vmem:[#allocation2 + $0x4] sm:$0xf] %v271_v5  ;;  %2221 = vmatpush1.bf16.msra.mxu0 %v3052_v39  ;;  %2757 = vmatprep.subr.bf16.mxu1 %v3787_v58 }
  0x4f   :  { %v3796_v10 = vld [vmem:[#allocation2 + $0x154] ss:$12 sps:$4 sm:$0xff]   ;;  %v113_v16 = vrot.slane %v20_v0, 6  ;;  %45 = vst [vmem:[#allocation2 + $0x60] sm:$0xf] %v20_v0  ;;  %v1103_v51 = vrot.slane %v3798_v13, 3  ;;  %2765 = vmatpush1.bf16.msra.mxu1 %v3055_v30 }
  0x50   :  { %v3803_v2 = vld [vmem:[#allocation2 + $0x1b8] ss:$12 sps:$4 sm:$0xff]   ;;  %505 = vst [vmem:[#allocation2 + $0x178] sm:$0xf] %v421_v63  ;;  %v1105_v26 = vrot.slane %v3796_v10, 3 }
  0x51   :  { %v21_v19 = vld [vmem:[%s4752_s0 + $0x24] sm:$0xf]  ;;  %v114_v34 = vsel %vm3312_vm2, %v112_v45, %v113_v16  ;;  %v115_v53 = vrot.slane %v113_v16, 4  ;;  %v1131_v47 = vrot.slane %v3803_v2, 3  ;;  %v3817_v21 = vld [vmem:[%s4752_s0 + $0x28] sm:$0xf]  ;;  %v1104_v45 = vsel %vm1087_vm3, %v1097_v43, %v1103_v51 }
  0x52   :  { %v116_v0 = vrot.slane %v21_v19, 6  ;;  %196 = vst [vmem:[#allocation2 + $0x180] sm:$0xf] %v114_v34  ;;  %46 = vst [vmem:[#allocation2 + $0x6c] sm:$0xf] %v21_v19  ;;  %v1106_v39 = vsel %vm1087_vm3, %v1099_v40, %v1105_v26  ;;  %v423_v27 = vrot.slane %v3817_v21, 5 }
  0x53   :  { %v3829_v30 = vld [vmem:[#allocation2 + $0x1d0] ss:$12 sps:$4 sm:$0xff]   ;;  %v3834_v5 = vld [vmem:[%s4752_s0 + $0x2c] sm:$0xf]  ;;  %1494 = vmatprep.mubr.bf16.mxu1 %v1106_v39  ;;  %v1132_v22 = vsel %vm1087_vm3, %v1125_v14, %v1131_v47  ;;  %v3064_v39 = vld [vmem:[%s4751_s1 + $0x144] ss:$16 sps:$4 sm:$0xff]  }
  0x54   :  { %v117_v40 = vsel %vm3312_vm2, %v115_v53, %v116_v0  ;;  %v426_v43 = vrot.slane %v3834_v5, 5  ;;  %v3848_v63 = vld [vmem:[%s4752_s0 + $0x4c] sm:$0xf]  ;;  %v3853_v16 = vld [vmem:[%s4752_s0 + $0x50] sm:$0xf]  ;;  %v1137_v6 = vrot.slane %v3829_v30, 3  ;;  %v424_v34 = vsel %vm3501_vm8, %v422_v28, %v423_v27  ;;  %1696 = vmatmul.mubr.bf16.gmra.mrb[24].mxu0 %v1132_v22  ;;  %2222 = vmatprep.subr.bf16.mxu0 %v3064_v39 }
  0x55   :  { %197 = vst [vmem:[#allocation2 + $0x18c] sm:$0xf] %v117_v40  ;;  %713 = vst [vmem:[#allocation2 + $0x1e8] sm:$0xf] %v3848_v63  ;;  %v3062_v14 = vld [vmem:[%s4751_s1 + $0x140] ss:$16 sps:$4 sm:$0xff]   ;;  %1495 = vmatmul.mubr.bf16.gmra.mrb[8].mxu1 %v1104_v45  ;;  %1705 = vmatprep.mubr.bf16.mxu0 %v4761_v1 }
  0x56   :  { %714 = vst [vmem:[#allocation2 + $0x1f4] sm:$0xf] %v3853_v16  ;;  %v118_v19 = vrot.slane %v116_v0, 4  ;;  %v425_v53 = vrot.slane %v423_v27, 4  ;;  %v22_v40 = vld [vmem:[%s4752_s0 + $0x28] sm:$0xf]  ;;  %2223 = vmatpush1.bf16.msra.mxu0 %v3062_v14 }
  0x57   :  { %v428_v62 = vrot.slane %v426_v43, 4  ;;  %v3869_v36 = vld [vmem:[#allocation2 + $0x16c] ss:$12 sps:$4 sm:$0xff]   ;;  %v3871_v8 = vld [vmem:[#allocation2 + $0x168] ss:$12 sps:$4 sm:$0xff]   ;;  %v119_v0 = vrot.slane %v22_v40, 6 }
  0x58   :  { %506 = vst [vmem:[#allocation2 + $0x184] sm:$0xf] %v424_v34  ;;  %47 = vst [vmem:[#allocation2 + $0x78] sm:$0xf] %v22_v40  ;;  %v427_v28 = vsel %vm3501_vm8, %v425_v53, %v426_v43  ;;  %v23_v27 = vld [vmem:[%s4752_s0 + $0x2c] sm:$0xf] }
  0x59   :  { %v3882_v45 = vld [vmem:[%s4752_s0 + $0x30] sm:$0xf]  ;;  %v3887_v22 = vld [vmem:[%s4752_s0 + $0x34] sm:$0xf]  ;;  %v1111_v34 = vrot.slane %v3869_v36, 3  ;;  %v1109_v40 = vrot.slane %v3871_v8, 3  ;;  %v120_v43 = vsel %vm3312_vm2, %v118_v19, %v119_v0 }
  0x5a   :  { %507 = vst [vmem:[#allocation2 + $0x190] sm:$0xf] %v427_v28  ;;  %v121_v53 = vrot.slane %v119_v0, 4  ;;  %48 = vst [vmem:[#allocation2 + $0x84] sm:$0xf] %v23_v27  ;;  %v122_v23 = vrot.slane %v23_v27, 6 }
  0x5b   :  { %v3896_v39 = vld [vmem:[%s4752_s0 + $0x54] sm:$0xf]  ;;  %198 = vst [vmem:[#allocation2 + $0x198] sm:$0xf] %v120_v43  ;;  %v429_v44 = vrot.slane %v3882_v45, 5  ;;  %v432_v25 = vrot.slane %v3887_v22, 5  ;;  %v1112_v19 = vsel %vm1087_vm3, %v1105_v26, %v1111_v34  ;;  %v1110_v10 = vsel %vm1087_vm3, %v1103_v51, %v1109_v40 }
  0x5c   :  { %v3903_v14 = vld [vmem:[%s4752_s0 + $0x58] sm:$0xf]  ;;  %715 = vst [vmem:[#allocation2 + $0x200] sm:$0xf] %v3896_v39  ;;  %v3069_v0 = vld [vmem:[%s4751_s1 + $0x160] ss:$16 sps:$4 sm:$0xff]   ;;  %1504 = vmatprep.mubr.bf16.mxu1 %v1112_v19  ;;  %v1138_v26 = vsel %vm1087_vm3, %v1131_v47, %v1137_v6  ;;  %v123_v54 = vsel %vm3312_vm2, %v121_v53, %v122_v23 }
  0x5d   :  { %716 = vst [vmem:[#allocation2 + $0x20c] sm:$0xf] %v3903_v14  ;;  %v3071_v28 = vld [vmem:[%s4751_s1 + $0x164] ss:$16 sps:$4 sm:$0xff]   ;;  %v3920_v27 = vrot.slane %v270_v48, 4  ;;  %v430_v48 = vsel %vm3501_vm8, %v428_v62, %v429_v44  ;;  %v431_v19 = vrot.slane %v429_v44, 4  ;;  %1505 = vmatmul.mubr.bf16.gmra.mrb[12].mxu1 %v1110_v10  ;;  %1706 = vmatmul.mubr.bf16.gmra.mrb[28].mxu0 %v1138_v26 }
  0x5e   :  { %v3932_v43 = vld [vmem:[#allocation2 + $0x1e8] ss:$12 sps:$4 sm:$0xff]   ;;  %199 = vst [vmem:[#allocation2 + $0x1a4] sm:$0xf] %v123_v54  ;;  %508 = vst [vmem:[#allocation2 + $0x19c] sm:$0xf] %v430_v48  ;;  %2224 = vmatprep.subr.bf16.mxu0 %v3071_v28  ;;  %1715 = vmatprep.mubr.bf16.mxu0 %v4761_v1 }
  0x5f   :  { %v3941_v13 = vld [vmem:[%s4751_s1 + $0x260] ss:$16 sps:$4 sm:$0xff]   ;;  %v3946_v2 = vld [vmem:[%s4751_s1 + $0x264] ss:$16 sps:$4 sm:$0xff]   ;;  %v4760_v51 = vrot.slane %v3932_v43, 3  ;;  %2225 = vmatpush1.bf16.msra.mxu0 %v3069_v0  ;;  %v124_v47 = vrot.slane %v122_v23, 4  ;;  %v433_v62 = vsel %vm3501_vm8, %v431_v19, %v432_v25 }
  0x60   :  { %v434_v53 = vrot.slane %v432_v25, 4  ;;  %v3075_v44 = vld [vmem:[%s4751_s1 + $0x180] ss:$16 sps:$4 sm:$0xff]   ;;  %v3077_v28 = vld [vmem:[%s4751_s1 + $0x184] ss:$16 sps:$4 sm:$0xff]   ;;  %2758 = vmatprep.subr.bf16.mxu1 %v3946_v2  ;;  %v294_v60 = vrot.slane %v3817_v21, 7 }
  0x61   :  { %v24_v54 = vld [vmem:[%s4752_s0 + $0x30] sm:$0xf]  ;;  %v3963_v23 = vld [vmem:[#allocation2 + $0x180] ss:$12 sps:$4 sm:$0xff]   ;;  %509 = vst [vmem:[#allocation2 + $0x1a8] sm:$0xf] %v433_v62  ;;  %2766 = vmatpush1.bf16.msra.mxu1 %v3941_v13  ;;  %2226 = vmatprep.subr.bf16.mxu0 %v3077_v28  ;;  %v1144_v28 = vsel %vm1087_vm3, %v1137_v6, %v4760_v51 }
  0x62   :  { %v3960_v0 = vld [vmem:[#allocation2 + $0x184] ss:$12 sps:$4 sm:$0xff]   ;;  %v125_v25 = vrot.slane %v24_v54, 6  ;;  %49 = vst [vmem:[#allocation2 + $0x90] sm:$0xf] %v24_v54  ;;  %v1115_v19 = vrot.slane %v3963_v23, 3 }
  0x63   :  { %v25_v10 = vld [vmem:[%s4752_s0 + $0x34] sm:$0xf]  ;;  %v3973_v26 = vld [vmem:[%s4752_s0 + $0x38] sm:$0xf]  ;;  %v1117_v48 = vrot.slane %v3960_v0, 3  ;;  %2227 = vmatpush1.bf16.msra.mxu0 %v3075_v44 }
  0x64   :  { %v3977_v62 = vld [vmem:[#allocation2 + $0x200] ss:$12 sps:$4 sm:$0xff]   ;;  %v126_v54 = vsel %vm3312_vm2, %v124_v47, %v125_v25  ;;  %50 = vst [vmem:[#allocation2 + $0x9c] sm:$0xf] %v25_v10  ;;  %v127_v18 = vrot.slane %v125_v25, 4  ;;  %v128_v24 = vrot.slane %v25_v10, 6  ;;  %v1116_v30 = vsel %vm1087_vm3, %v1109_v40, %v1115_v19 }
  0x65   :  { %200 = vst [vmem:[#allocation2 + $0x1b0] sm:$0xf] %v126_v54  ;;  %v3989_v0 = vld [vmem:[%s4752_s0 + $0x3c] sm:$0xf]  ;;  %v435_v23 = vrot.slane %v3973_v26, 5  ;;  %v1118_v47 = vsel %vm1087_vm3, %v1111_v34, %v1117_v48  ;;  %v4765_v6 = vrot.slane %v3977_v62, 3  ;;  %1716 = vmatmul.mubr.bf16.gmra.mrb[32].mxu0 %v1144_v28 }
  0x66   :  { %v438_v44 = vrot.slane %v3989_v0, 5  ;;  %v4003_v25 = vld [vmem:[%s4752_s0 + $0x5c] sm:$0xf]  ;;  %1514 = vmatprep.mubr.bf16.mxu1 %v1118_v47  ;;  %v129_v10 = vsel %vm3312_vm2, %v127_v18, %v128_v24  ;;  %v4012_v8 = vld [vmem:[%s4752_s0 + $0x60] sm:$0xf]  ;;  %v130_v54 = vrot.slane %v128_v24, 4  ;;  %1725 = vmatprep.mubr.bf16.mxu0 %v4761_v1 }
  0x67   :  { %4786 = vst [vmem:[#allocation8_spill] sm:$0xff] %v4003_v25  ;;  %v436_v36 = vsel %vm3501_vm8, %v434_v53, %v435_v23  ;;  %v437_v34 = vrot.slane %v435_v23, 4  ;;  %4787 = vst [vmem:[#allocation9_spill] sm:$0xff] %v4012_v8  ;;  %v3082_v40 = vld [vmem:[%s4751_s1 + $0x1a0] ss:$16 sps:$4 sm:$0xff]   ;;  %1515 = vmatmul.mubr.bf16.gmra.mrb[16].mxu1 %v1116_v30  ;;  %v4789_v1 = vrot.slane %v3932_v43, 3 }
  0x68   :  { %717 = vst [vmem:[#allocation2 + $0x218] sm:$0xf] %v4003_v25  ;;  %201 = vst [vmem:[#allocation2 + $0x1bc] sm:$0xf] %v129_v10  ;;  %v3084_v18 = vld [vmem:[%s4751_s1 + $0x1a4] ss:$16 sps:$4 sm:$0xff]  }
  0x69   :  { %510 = vst [vmem:[#allocation2 + $0x1b4] sm:$0xf] %v436_v36  ;;  %718 = vst [vmem:[#allocation2 + $0x224] sm:$0xf] %v4012_v8  ;;  %v4025_v53 = vld [vmem:[%s4751_s1 + $0x280] ss:$16 sps:$4 sm:$0xff]   ;;  %v439_v10 = vsel %vm3501_vm8, %v437_v34, %v438_v44  ;;  %2228 = vmatprep.subr.bf16.mxu0 %v3084_v18  ;;  %v1150_v55 = vsel %vm1087_vm3, %v4789_v1, %v4765_v6 }
  0x6a   :  { %4788 = vst [vmem:[#allocation10_spill] sm:$0xff] %v4025_v53  ;;  %v4027_v23 = vld [vmem:[#allocation2 + $0x19c] ss:$12 sps:$4 sm:$0xff]   ;;  %v4029_v47 = vld [vmem:[#allocation2 + $0x198] ss:$12 sps:$4 sm:$0xff]   ;;  %v440_v36 = vrot.slane %v438_v44, 4  ;;  %2229 = vmatpush1.bf16.msra.mxu0 %v3082_v40 }
  0x6b   :  { %511 = vst [vmem:[#allocation2 + $0x1c0] sm:$0xf] %v439_v10  ;;  %v4037_v51 = vld [vmem:[%s4751_s1 + $0x284] ss:$16 sps:$4 sm:$0xff]   ;;  %v26_v24 = vld [vmem:[%s4752_s0 + $0x38] sm:$0xf] }
  0x6c   :  { %v27_v28 = vld [vmem:[%s4752_s0 + $0x3c] sm:$0xf]  ;;  %v1123_v30 = vrot.slane %v4027_v23, 3  ;;  %v131_v34 = vrot.slane %v26_v24, 6  ;;  %v4050_v10 = vld [vmem:[%s4752_s0 + $0x40] sm:$0xf]  ;;  %2759 = vmatprep.subr.bf16.mxu1 %v4037_v51 }
  0x6d   :  { %v134_v18 = vrot.slane %v27_v28, 6  ;;  %51 = vst [vmem:[#allocation2 + $0xa8] sm:$0xf] %v26_v24  ;;  %52 = vst [vmem:[#allocation2 + $0xb4] sm:$0xf] %v27_v28  ;;  %v441_v23 = vrot.slane %v4050_v10, 5  ;;  %2767 = vmatpush1.bf16.msra.mxu1 %v4025_v53  ;;  %1726 = vmatmul.mubr.bf16.gmra.mrb[36].mxu0 %v1150_v55 }
  0x6e   :  { %v4061_v40 = vld [vmem:[%s4752_s0 + $0x44] sm:$0xf]  ;;  %v1124_v44 = vsel %vm1087_vm3, %v1117_v48, %v1123_v30  ;;  %v4790_v24 = vrot.slane %v4029_v47, 3  ;;  %v132_v43 = vsel %vm3312_vm2, %v130_v54, %v131_v34  ;;  %v133_v32 = vrot.slane %v131_v34, 4 }
  0x6f   :  { %v4071_v1 = vld [vmem:[#allocation2 + $0x230] ss:$12 sps:$4 sm:$0x1f]   ;;  %1524 = vmatprep.mubr.bf16.mxu1 %v1124_v44  ;;  %202 = vst [vmem:[#allocation2 + $0x1c8] sm:$0xf] %v132_v43  ;;  %v442_v6 = vsel %vm3501_vm8, %v440_v36, %v441_v23  ;;  %v443_v50 = vrot.slane %v441_v23, 4 }
  0x70   :  { %v1122_v28 = vsel %vm1087_vm3, %v1115_v19, %v4790_v24  ;;  %v444_v48 = vrot.slane %v4061_v40, 5  ;;  %v136_v8 = vrot.slane %v134_v18, 4  ;;  %v3081_v25 = vld [vmem:[#allocation2 + $0x218] ss:$12 sps:$4 sm:$0xff]   ;;  %v135_v19 = vsel %vm3312_vm2, %v133_v32, %v134_v18  ;;  %512 = vst [vmem:[#allocation2 + $0x1cc] sm:$0xf] %v442_v6 }
  0x71   :  { %v4791_v34 = vrot.slane %v3290_v31, 6  ;;  %v4792_v24 = vrot.slane %v3282_v29, 10  ;;  %v4793_v36 = vrot.slane %v3337_v49, 6  ;;  %203 = vst [vmem:[#allocation2 + $0x1d4] sm:$0xf] %v135_v19  ;;  %1525 = vmatmul.mubr.bf16.gmra.mrb[20].mxu1 %v1122_v28  ;;  %v4794_v43 = vmov 0  }
  0x72   :  { %v445_v32 = vsel %vm3501_vm8, %v443_v50, %v444_v48  ;;  %v3092_v6 = vld [vmem:[%s4751_s1 + $0x1c0] ss:$16 sps:$4 sm:$0xff]   ;;  %v3094_v29 = vld [vmem:[%s4751_s1 + $0x1c4] ss:$16 sps:$4 sm:$0xff]   ;;  %v1155_v50 = vrot.slane %v3081_v25, 3  ;;  %1735 = vmatprep.mubr.bf16.mxu0 %v4794_v43  ;;  %v446_v55 = vrot.slane %v444_v48, 4 }
  0x73   :  { %v576_v44 = vsel %vm3312_vm2, %v4792_v24, %v4791_v34  ;;  %v579_v23 = vsel %vm3312_vm2, %v3630_v11, %v4793_v36  ;;  %v28_v31 = vld [vmem:[%s4752_s0 + $0x40] sm:$0xf]  ;;  %v4103_v18 = vld [vmem:[#allocation2 + $0x1b0] ss:$12 sps:$4 sm:$0xff]   ;;  %513 = vst [vmem:[#allocation2 + $0x1d8] sm:$0xf] %v445_v32  ;;  %2230 = vmatprep.subr.bf16.mxu0 %v3094_v29 }
  0x74   :  { %672 = vst [vmem:[#allocation2 + $0x8] sm:$0xf] %v576_v44  ;;  %673 = vst [vmem:[#allocation2 + $0x14] sm:$0xf] %v579_v23  ;;  %v4101_v11 = vld [vmem:[#allocation2 + $0x1b4] ss:$12 sps:$4 sm:$0xff]   ;;  %2231 = vmatpush1.bf16.msra.mxu0 %v3092_v6 }
  0x75   :  { %53 = vst [vmem:[#allocation2 + $0xc0] sm:$0xf] %v28_v31  ;;  %v29_v19 = vld [vmem:[%s4752_s0 + $0x44] sm:$0xf]  ;;  %v137_v34 = vrot.slane %v28_v31, 6  ;;  %v4769_v24 = vrot.slane %v4101_v11, 3 }
  0x76   :  { %v4112_v28 = vld [vmem:[%s4752_s0 + $0x48] sm:$0xf]  ;;  %v4119_v44 = vld [vmem:[%s4752_s0 + $0x4c] sm:$0xf]  ;;  %54 = vst [vmem:[#allocation2 + $0xcc] sm:$0xf] %v29_v19 }
  0x77   :  { %v138_v36 = vsel %vm3312_vm2, %v136_v8, %v137_v34  ;;  %v139_v23 = vrot.slane %v137_v34, 4  ;;  %v140_v32 = vrot.slane %v29_v19, 6  ;;  %v447_v29 = vrot.slane %v4112_v28, 5  ;;  %v3098_v48 = vld [vmem:[%s4751_s1 + $0x1e0] ss:$16 sps:$4 sm:$0xff]  }
  0x78   :  { %v1130_v6 = vsel %vm1087_vm3, %v1123_v30, %v4769_v24  ;;  %v4795_v31 = vrot.slane %v3977_v62, 3  ;;  %204 = vst [vmem:[#allocation2 + $0x1e0] sm:$0xf] %v138_v36  ;;  %v450_v25 = vrot.slane %v4119_v44, 5  ;;  %v3100_v8 = vld [vmem:[%s4751_s1 + $0x1e4] ss:$16 sps:$4 sm:$0xff]  }
  0x79   :  { %v4140_v19 = vld [vmem:[%s4751_s1 + $0x2a0] ss:$16 sps:$4 sm:$0xff]   ;;  %1534 = vmatprep.mubr.bf16.mxu1 %v1130_v6  ;;  %v4797_v34 = vrot.slane %v4103_v18, 3  ;;  %v4798_v30 = vrot.slane %v4029_v47, 3  ;;  %v141_v36 = vsel %vm3312_vm2, %v139_v23, %v140_v32  ;;  %v449_v24 = vrot.slane %v447_v29, 4  ;;  %2232 = vmatprep.subr.bf16.mxu0 %v3100_v8 }
  0x7a   :  { %v1156_v54 = vsel %vm1087_vm3, %v4795_v31, %v1155_v50  ;;  %4796 = vst [vmem:[#allocation11_spill] sm:$0xff] %v4140_v19  ;;  %v448_v31 = vsel %vm3501_vm8, %v446_v55, %v447_v29  ;;  %v4154_v49 = vld [vmem:[%s4751_s1 + $0x2a4] ss:$16 sps:$4 sm:$0xff]   ;;  %v30_v6 = vld [vmem:[%s4752_s0 + $0x48] sm:$0xf]  ;;  %v142_v23 = vrot.slane %v140_v32, 4  ;;  %2233 = vmatpush1.bf16.msra.mxu0 %v3098_v48 }
  0x7b   :  { %v1128_v62 = vsel %vm1087_vm3, %v4798_v30, %v4797_v34  ;;  %4799 = vst [vmem:[#allocation12_spill] sm:$0xff] %v4154_v49  ;;  %205 = vst [vmem:[#allocation2 + $0x1ec] sm:$0xf] %v141_v36  ;;  %v31_v47 = vld [vmem:[%s4752_s0 + $0x4c] sm:$0xf]  ;;  %v143_v34 = vrot.slane %v30_v6, 6  ;;  %2760 = vmatprep.subr.bf16.mxu1 %v4154_v49  ;;  %1736 = vmatmul.mubr.bf16.gmra.mrb[40].mxu0 %v1156_v54 }
  0x7c   :  { %514 = vst [vmem:[#allocation2 + $0x1e4] sm:$0xf] %v448_v31  ;;  %v4165_v55 = vld [vmem:[%s4752_s0 + $0x50] sm:$0xf]  ;;  %55 = vst [vmem:[#allocation2 + $0xd8] sm:$0xf] %v30_v6  ;;  %v451_v31 = vsel %vm3501_vm8, %v449_v24, %v450_v25  ;;  %1535 = vmatmul.mubr.bf16.gmra.mrb[24].mxu1 %v1128_v62  ;;  %1745 = vmatprep.mubr.bf16.mxu0 %v4794_v43 }
  0x7d   :  { %v4167_v29 = vld [vmem:[#allocation2 + $0x1cc] ss:$12 sps:$4 sm:$0xff]   ;;  %v4169_v30 = vld [vmem:[#allocation2 + $0x1c8] ss:$12 sps:$4 sm:$0xff]   ;;  %v4800_v36 = vrot.slane %v4071_v1, 3  ;;  %v146_v32 = vrot.slane %v31_v47, 6  ;;  %v144_v6 = vsel %vm3312_vm2, %v142_v23, %v143_v34  ;;  %2768 = vmatpush1.bf16.msra.mxu1 %v4140_v19  ;;  %2363 = vmatprep.subr.bf16.mxu0 %v3580_v42 }
  0x7e   :  { %56 = vst [vmem:[#allocation2 + $0xe4] sm:$0xf] %v31_v47  ;;  %515 = vst [vmem:[#allocation2 + $0x1f0] sm:$0xf] %v451_v31  ;;  %v145_v53 = vrot.slane %v143_v34, 4  ;;  %v453_v24 = vrot.slane %v4165_v55, 5 }
  0x7f   :  { %v4174_v8 = vsel %vm1087_vm3, %v1155_v50, %v4800_v36  ;;  %v4184_v50 = vld [vmem:[%s4752_s0 + $0x54] sm:$0xf]  ;;  %v452_v36 = vrot.slane %v450_v25, 4  ;;  %206 = vst [vmem:[#allocation2 + $0x1f8] sm:$0xf] %v144_v6  ;;  %v148_v48 = vrot.slane %v146_v32, 4 }
  0x80   :  { %v456_v54 = vrot.slane %v4184_v50, 5  ;;  %v3168_v47 = vld [vmem:[%s4752_s0 + $0xc] sm:$0xf]  ;;  %v32_v25 = vld [vmem:[%s4752_s0 + $0x50] sm:$0xf]  ;;  %v147_v34 = vsel %vm3312_vm2, %v145_v53, %v146_v32  ;;  %v455_v62 = vrot.slane %v453_v24, 4 }
  0x81   :  { %v273_v23 = vrot.slane %v3168_v47, 7  ;;  %v454_v31 = vsel %vm3501_vm8, %v452_v36, %v453_v24  ;;  %v33_v6 = vld [vmem:[%s4752_s0 + $0x54] sm:$0xf]  ;;  %v4209_v47 = vld [vmem:[%s4752_s0 + $0x58] sm:$0xf]  ;;  %v4801_v19 = vrot.slane %v4167_v29, 3 }
  0x82   :  { %57 = vst [vmem:[#allocation2 + $0xf0] sm:$0xf] %v32_v25  ;;  %v4802_v53 = vrot.slane %v4101_v11, 3  ;;  %v4803_v24 = vrot.slane %v4169_v30, 3  ;;  %v4804_v42 = vrot.slane %v4103_v18, 3  ;;  %v149_v59 = vrot.slane %v32_v25, 6 }
  0x83   :  { %207 = vst [vmem:[#allocation2 + $0x204] sm:$0xf] %v147_v34  ;;  %516 = vst [vmem:[#allocation2 + $0x1fc] sm:$0xf] %v454_v31  ;;  %v274_v32 = vsel %vm3537_vm9, %v3920_v27, %v273_v23  ;;  %v4227_v11 = vld [vmem:[%s4751_s1 + $0x2c0] ss:$16 sps:$4 sm:$0xff]   ;;  %1746 = vmatmul.mubr.bf16.gmra.mrb[44].mxu0 %v4174_v8 }
  0x84   :  { %v1136_v36 = vsel %vm1087_vm3, %v4802_v53, %v4801_v19  ;;  %v1134_v49 = vsel %vm1087_vm3, %v4804_v42, %v4803_v24  ;;  %58 = vst [vmem:[#allocation2 + $0xfc] sm:$0xf] %v33_v6  ;;  %v457_v19 = vsel %vm3501_vm8, %v455_v62, %v456_v54  ;;  %370 = vst [vmem:[#allocation2 + $0x10] sm:$0xf] %v274_v32  ;;  %v152_v18 = vrot.slane %v33_v6, 6 }
  0x85   :  { %1544 = vmatprep.mubr.bf16.mxu1 %v1136_v36  ;;  %v458_v53 = vrot.slane %v456_v54, 4  ;;  %v459_v34 = vrot.slane %v4209_v47, 5  ;;  %v4235_v27 = vld [vmem:[%s4751_s1 + $0x2c4] ss:$16 sps:$4 sm:$0xff]   ;;  %517 = vst [vmem:[#allocation2 + $0x208] sm:$0xf] %v457_v19  ;;  %v150_v25 = vsel %vm3312_vm2, %v148_v48, %v149_v59  ;;  %1755 = vmatprep.mubr.bf16.mxu0 %v4794_v43 }
  0x86   :  { %v151_v31 = vrot.slane %v149_v59, 4  ;;  %v3169_v36 = vld [vmem:[%s4752_s0 + $0x5c] sm:$0xf]  ;;  %v275_v24 = vrot.slane %v273_v23, 4  ;;  %208 = vst [vmem:[#allocation2 + $0x210] sm:$0xf] %v150_v25  ;;  %2761 = vmatprep.subr.bf16.mxu1 %v4235_v27  ;;  %1545 = vmatmul.mubr.bf16.gmra.mrb[28].mxu1 %v1134_v49 }
  0x87   :  { %v462_v62 = vrot.slane %v3169_v36, 5  ;;  %v460_v54 = vsel %vm3501_vm8, %v458_v53, %v459_v34  ;;  %v461_v6 = vrot.slane %v459_v34, 4  ;;  %v276_v42 = vrot.slane %v3593_v56, 7  ;;  %v4250_v59 = vld [vmem:[%s4751_s1 + $0x2e0] ss:$16 sps:$4 sm:$0xff]   ;;  %2769 = vmatpush1.bf16.msra.mxu1 %v4227_v11 }
  0x88   :  { %v279_v32 = vrot.slane %v3598_v57, 7  ;;  %v3095_v48 = vld [vmem:[#allocation2 + $0x1e4] ss:$12 sps:$4 sm:$0xff]   ;;  %v4252_v19 = vld [vmem:[#allocation2 + $0x1e0] ss:$12 sps:$4 sm:$0xff]   ;;  %v153_v23 = vsel %vm3312_vm2, %v151_v31, %v152_v18  ;;  %v154_v53 = vrot.slane %v152_v18, 4 }
  0x89   :  { %518 = vst [vmem:[#allocation2 + $0x214] sm:$0xf] %v460_v54  ;;  %209 = vst [vmem:[#allocation2 + $0x21c] sm:$0xf] %v153_v23  ;;  %v463_v56 = vsel %vm3501_vm8, %v461_v6, %v462_v62  ;;  %v277_v57 = vsel %vm3537_vm9, %v275_v24, %v276_v42  ;;  %v278_v34 = vrot.slane %v276_v42, 4  ;;  %v464_v25 = vrot.slane %v462_v62, 4 }
  0x8a   :  { %v4265_v31 = vld [vmem:[%s4751_s1 + $0x2e4] ss:$16 sps:$4 sm:$0xff]   ;;  %v1141_v36 = vrot.slane %v3095_v48, 3  ;;  %v1139_v49 = vrot.slane %v4252_v19, 3  ;;  %519 = vst [vmem:[#allocation2 + $0x220] sm:$0xf] %v463_v56 }
  0x8b   :  { %371 = vst [vmem:[#allocation2 + $0x1c] sm:$0xf] %v277_v57  ;;  %v4805_v8 = vrot.slane %v3441_v33, 6  ;;  %v3170_v62 = vld [vmem:[%s4752_s0 + $0x60] sm:$0xf]  ;;  %v280_v54 = vsel %vm3537_vm9, %v278_v34, %v279_v32  ;;  %v281_v48 = vrot.slane %v279_v32, 4  ;;  %2762 = vmatprep.subr.bf16.mxu1 %v4265_v31 }
  0x8c   :  { %v465_v24 = vrot.slane %v3170_v62, 5  ;;  %v3171_v6 = vld [vmem:[%s4752_s0 + $0x64] sm:$0xf]  ;;  %v282_v33 = vrot.slane %v3666_v52, 7  ;;  %v4806_v23 = vrot.slane %v4167_v29, 3  ;;  %2770 = vmatpush1.bf16.msra.mxu1 %v4250_v59  ;;  %v4807_v32 = vrot.slane %v4169_v30, 3 }
  0x8d   :  { %v156_v18 = vsel %vm3312_vm2, %v154_v53, %v4805_v8  ;;  %v468_v42 = vrot.slane %v3171_v6, 5  ;;  %v3108_v56 = vld [vmem:[#allocation2 + $0x4] ss:$12 sps:$4 sm:$0xff]   ;;  %372 = vst [vmem:[#allocation2 + $0x28] sm:$0xf] %v280_v54  ;;  %v288_v54 = vrot.slane %v3736_v61, 7 }
  0x8e   :  { %210 = vst [vmem:[#allocation2 + $0x228] sm:$0xf] %v156_v18  ;;  %v1142_v53 = vsel %vm1087_vm3, %v4806_v23, %v1141_v36  ;;  %v466_v57 = vsel %vm3501_vm8, %v464_v25, %v465_v24  ;;  %v467_v34 = vrot.slane %v465_v24, 4  ;;  %v1140_v52 = vsel %vm1087_vm3, %v4807_v32, %v1139_v49  ;;  %v3104_v8 = vld [vmem:[#allocation2 + $0x1fc] ss:$12 sps:$4 sm:$0xff]  }
  0x8f   :  { %1554 = vmatprep.mubr.bf16.mxu1 %v1142_v53  ;;  %v4294_v18 = vld [vmem:[#allocation2 + $0x1f8] ss:$12 sps:$4 sm:$0xff]   ;;  %520 = vst [vmem:[#allocation2 + $0x22c] sm:$0xf] %v466_v57  ;;  %v283_v29 = vsel %vm3537_vm9, %v281_v48, %v282_v33  ;;  %v284_v62 = vrot.slane %v282_v33, 4  ;;  %v285_v24 = vrot.slane %v3674_v41, 7 }
  0x90   :  { %v469_v25 = vsel %vm3501_vm8, %v467_v34, %v468_v42  ;;  %373 = vst [vmem:[#allocation2 + $0x34] sm:$0xf] %v283_v29  ;;  %v1147_v6 = vrot.slane %v3104_v8, 3  ;;  %v1145_v30 = vrot.slane %v4294_v18, 3  ;;  %v291_v23 = vrot.slane %v3744_v7, 7  ;;  %1555 = vmatmul.mubr.bf16.gmra.mrb[32].mxu1 %v1140_v52 }
  0x91   :  { %521 = vst [vmem:[#allocation2 + $0x238] sm:$0xf] %v469_v25  ;;  %v286_v53 = vsel %vm3537_vm9, %v284_v62, %v285_v24  ;;  %v287_v57 = vrot.slane %v285_v24, 4  ;;  %v290_v48 = vrot.slane %v288_v54, 4  ;;  %v4808_v42 = vrot.slane %v4071_v1, 3 }
  0x92   :  { %v1148_v41 = vsel %vm1087_vm3, %v1141_v36, %v1147_v6  ;;  %v4310_v61 = vld [vmem:[#allocation2 + $0x214] ss:$12 sps:$4 sm:$0xff]   ;;  %374 = vst [vmem:[#allocation2 + $0x40] sm:$0xf] %v286_v53  ;;  %v293_v33 = vrot.slane %v291_v23, 4  ;;  %v297_v34 = vrot.slane %v3834_v5, 7 }
  0x93   :  { %1756 = vmatmul.mubr.bf16.gmra.mrb[48].mxu0 %v4808_v42  ;;  %1564 = vmatprep.mubr.bf16.mxu1 %v1148_v41  ;;  %v289_v7 = vsel %vm3537_vm9, %v287_v57, %v288_v54  ;;  %v292_v21 = vsel %vm3537_vm9, %v290_v48, %v291_v23  ;;  %v296_v32 = vrot.slane %v294_v60, 4  ;;  %v300_v1 = vrot.slane %v3882_v45, 7  ;;  %v3106_v24 = vld [vmem:[#allocation2] ss:$12 sps:$4 sm:$0xff]   ;;  %v3137_v38 = vld [vmem:[#allocation2 + $0x78] ss:$12 sps:$4 sm:$0xff]  }
  0x94   :  { %2234 = vmatprep.mubr.bf16.mxu0 %v3108_v56  ;;  %v1153_v52 = vrot.slane %v4310_v61, 3  ;;  %375 = vst [vmem:[#allocation2 + $0x4c] sm:$0xf] %v289_v7  ;;  %376 = vst [vmem:[#allocation2 + $0x58] sm:$0xf] %v292_v21  ;;  %v295_v36 = vsel %vm3537_vm9, %v293_v33, %v294_v60  ;;  %v4809_v5 = vrot.slane %v3401_v15, 6  ;;  %v1146_v15 = vsel %vm1087_vm3, %v1139_v49, %v1145_v30 }
  0x95   :  { %v4323_v56 = vld [vmem:[#allocation2 + $0x210] ss:$12 sps:$4 sm:$0xff]   ;;  %v298_v29 = vsel %vm3537_vm9, %v296_v32, %v297_v34  ;;  %377 = vst [vmem:[#allocation2 + $0x64] sm:$0xf] %v295_v36  ;;  %v299_v25 = vrot.slane %v297_v34, 4  ;;  %v302_v62 = vrot.slane %v300_v1, 4 }
  0x96   :  { %v595_v8 = vrot.slane %v4809_v5, 4  ;;  %378 = vst [vmem:[#allocation2 + $0x70] sm:$0xf] %v298_v29  ;;  %v303_v45 = vrot.slane %v3887_v22, 7  ;;  %v596_v54 = vrot.slane %v3533_v12, 6  ;;  %v306_v23 = vrot.slane %v3973_v26, 7 }
  0x97   :  { %v1154_v53 = vsel %vm1087_vm3, %v1147_v6, %v1153_v52  ;;  %v3112_v57 = vld [vmem:[#allocation2 + $0x1c] ss:$12 sps:$4 sm:$0xff]   ;;  %v301_v48 = vsel %vm3537_vm9, %v299_v25, %v300_v1  ;;  %v309_v22 = vrot.slane %v3989_v0, 7  ;;  %v1151_v42 = vrot.slane %v4323_v56, 3  ;;  %v3172_v34 = vld [vmem:[%s4751_s1 + $0x200] ss:$16 sps:$4 sm:$0xff]  }
  0x98   :  { %v4341_v60 = vld [vmem:[#allocation2 + $0x22c] ss:$12 sps:$4 sm:$0x1f]   ;;  %v304_v12 = vsel %vm3537_vm9, %v302_v62, %v303_v45  ;;  %379 = vst [vmem:[#allocation2 + $0x7c] sm:$0xf] %v301_v48  ;;  %v597_v26 = vsel %vm3312_vm2, %v595_v8, %v596_v54  ;;  %v305_v19 = vrot.slane %v303_v45, 4  ;;  %1565 = vmatmul.mubr.bf16.gmra.mrb[36].mxu1 %v1146_v15 }
  0x99   :  { %v308_v49 = vrot.slane %v306_v23, 4  ;;  %v4348_v6 = vld [vmem:[#allocation2 + $0x228] ss:$12 sps:$4 sm:$0x1f]   ;;  %380 = vst [vmem:[#allocation2 + $0x88] sm:$0xf] %v304_v12  ;;  %1574 = vmatprep.mubr.bf16.mxu1 %v1154_v53  ;;  %v1152_v56 = vsel %vm1087_vm3, %v1145_v30, %v1151_v42 }
  0x9a   :  { %679 = vst [vmem:[#allocation2 + $0x5c] sm:$0xf] %v597_v26  ;;  %v307_v0 = vsel %vm3537_vm9, %v305_v19, %v306_v23  ;;  %v598_v33 = vrot.slane %v596_v54, 4  ;;  %v599_v7 = vrot.slane %v3547_v17, 6  ;;  %v602_v21 = vrot.slane %v3613_v3, 6 }
  0x9b   :  { %2235 = vmatmul.mubr.bf16.vlgmr.msra.gmra.mrb[0].mxu0 %v3106_v24  ;;  %v310_v41 = vsel %vm3537_vm9, %v308_v49, %v309_v22  ;;  %381 = vst [vmem:[#allocation2 + $0x94] sm:$0xf] %v307_v0  ;;  %v3173_v32 = vld [vmem:[%s4751_s1 + $0x224] ss:$16 sps:$4 sm:$0xff]   ;;  %v1159_v1 = vrot.slane %v4341_v60, 3  ;;  %v311_v36 = vrot.slane %v309_v22, 4 }
  0x9c   :  { %2364 = vmatpush1.bf16.msra.mxu0 %v3172_v34  ;;  %382 = vst [vmem:[#allocation2 + $0xa0] sm:$0xf] %v310_v41  ;;  %2244 = vmatprep.mubr.bf16.mxu0 %v3112_v57  ;;  %v312_v5 = vrot.slane %v4050_v10, 7  ;;  %v315_v8 = vrot.slane %v4061_v40, 7  ;;  %v1157_v17 = vrot.slane %v4348_v6, 3  ;;  %v600_v3 = vsel %vm3312_vm2, %v598_v33, %v599_v7 }
  0x9d   :  { %2365 = vmatprep.subr.bf16.mxu0 %v3173_v32  ;;  %v601_v29 = vrot.slane %v599_v7, 4  ;;  %v3115_v25 = vld [vmem:[#allocation2 + $0x18] ss:$12 sps:$4 sm:$0xff]   ;;  %680 = vst [vmem:[#allocation2 + $0x68] sm:$0xf] %v600_v3  ;;  %v604_v45 = vrot.slane %v602_v21, 4 }
  0x9e   :  { %v313_v62 = vsel %vm3537_vm9, %v311_v36, %v312_v5  ;;  %v314_v24 = vrot.slane %v312_v5, 4  ;;  %v605_v10 = vrot.slane %v3625_v9, 6  ;;  %v3174_v40 = vld [vmem:[%s4751_s1 + $0x220] ss:$16 sps:$4 sm:$0xff]   ;;  %v608_v54 = vrot.slane %v3709_v46, 6 }
  0x9f   :  { %v3121_v18 = vld [vmem:[#allocation2 + $0x34] ss:$12 sps:$4 sm:$0xff]   ;;  %v603_v30 = vsel %vm3312_vm2, %v601_v29, %v602_v21  ;;  %383 = vst [vmem:[#allocation2 + $0xac] sm:$0xf] %v313_v62  ;;  %v317_v23 = vrot.slane %v315_v8, 4  ;;  %v318_v15 = vrot.slane %v4112_v28, 7  ;;  %v1160_v9 = vsel %vm1087_vm3, %v1153_v52, %v1159_v1 }
  0xa0   :  { %2366 = vmatpush1.bf16.msra.mxu0 %v3174_v40  ;;  %681 = vst [vmem:[#allocation2 + $0x74] sm:$0xf] %v603_v30  ;;  %v316_v53 = vsel %vm3537_vm9, %v314_v24, %v315_v8  ;;  %v606_v57 = vsel %vm3312_vm2, %v604_v45, %v605_v10  ;;  %v607_v48 = vrot.slane %v605_v10, 4  ;;  %v321_v61 = vrot.slane %v4119_v44, 7  ;;  %1575 = vmatmul.mubr.bf16.gmra.mrb[40].mxu1 %v1152_v56  ;;  %v3124_v21 = vld [vmem:[#allocation2 + $0x30] ss:$12 sps:$4 sm:$0xff]  }
  0xa1   :  { %2367 = vmatprep.subr.bf16.mxu0 %v3787_v58  ;;  %384 = vst [vmem:[#allocation2 + $0xb8] sm:$0xf] %v316_v53  ;;  %682 = vst [vmem:[#allocation2 + $0x80] sm:$0xf] %v606_v57  ;;  %v319_v46 = vsel %vm3537_vm9, %v317_v23, %v318_v15  ;;  %v320_v28 = vrot.slane %v318_v15, 4  ;;  %v1158_v58 = vsel %vm1087_vm3, %v1151_v42, %v1157_v17  ;;  %v610_v22 = vrot.slane %v608_v54, 4 }
  0xa2   :  { %v609_v52 = vsel %vm3312_vm2, %v607_v48, %v608_v54  ;;  %385 = vst [vmem:[#allocation2 + $0xc4] sm:$0xf] %v319_v46  ;;  %v611_v12 = vrot.slane %v3714_v37, 6  ;;  %1584 = vmatprep.mubr.bf16.mxu1 %v1160_v9  ;;  %v614_v44 = vrot.slane %v3749_v35, 6  ;;  %v323_v19 = vrot.slane %v321_v61, 4  ;;  %v4810_v24 = vld [vmem:[#allocation7_spill] sm:$0xff] }
  0xa3   :  { %2245 = vmatmul.mubr.bf16.gmra.mrb[4].mxu0 %v3115_v25  ;;  %683 = vst [vmem:[#allocation2 + $0x8c] sm:$0xf] %v609_v52  ;;  %v322_v26 = vsel %vm3537_vm9, %v320_v28, %v321_v61  ;;  %v324_v49 = vrot.slane %v4165_v55, 7  ;;  %v3175_v42 = vld [vmem:[%s4751_s1 + $0x240] ss:$16 sps:$4 sm:$0xff]   ;;  %v327_v41 = vrot.slane %v4184_v50, 7 }
  0xa4   :  { %2254 = vmatprep.mubr.bf16.mxu0 %v3121_v18  ;;  %2368 = vmatpush1.bf16.msra.mxu0 %v3175_v42  ;;  %386 = vst [vmem:[#allocation2 + $0xd0] sm:$0xf] %v322_v26  ;;  %v612_v37 = vsel %vm3312_vm2, %v610_v22, %v611_v12  ;;  %v613_v0 = vrot.slane %v611_v12, 4  ;;  %v617_v33 = vrot.slane %v3758_v20, 6  ;;  %v616_v34 = vrot.slane %v614_v44, 4  ;;  %v4812_v40 = vld [vmem:[#allocation8_spill] sm:$0xff] }
  0xa5   :  { %2369 = vmatprep.subr.bf16.mxu0 %v3946_v2  ;;  %684 = vst [vmem:[#allocation2 + $0x98] sm:$0xf] %v612_v37  ;;  %v325_v35 = vsel %vm3537_vm9, %v323_v19, %v324_v49  ;;  %v326_v55 = vrot.slane %v324_v49, 4  ;;  %v620_v7 = vrot.slane %v3848_v63, 6  ;;  %v329_v5 = vrot.slane %v327_v41, 4  ;;  %v4813_v18 = vld [vmem:[#allocation9_spill] sm:$0xff] }
  0xa6   :  { %v615_v32 = vsel %vm3312_vm2, %v613_v0, %v614_v44  ;;  %387 = vst [vmem:[#allocation2 + $0xdc] sm:$0xf] %v325_v35  ;;  %v619_v36 = vrot.slane %v617_v33, 4  ;;  %v330_v50 = vrot.slane %v4209_v47, 7  ;;  %v3128_v20 = vld [vmem:[#allocation2 + $0x4c] ss:$12 sps:$4 sm:$0xff]   ;;  %v618_v8 = vsel %vm3312_vm2, %v616_v34, %v617_v33 }
  0xa7   :  { %685 = vst [vmem:[#allocation2 + $0xa4] sm:$0xf] %v615_v32  ;;  %v328_v2 = vsel %vm3537_vm9, %v326_v55, %v327_v41  ;;  %v622_v56 = vrot.slane %v620_v7, 4  ;;  %v623_v63 = vrot.slane %v3853_v16, 6  ;;  %686 = vst [vmem:[#allocation2 + $0xb0] sm:$0xf] %v618_v8 }
  0xa8   :  { %2370 = vmatpush1.bf16.msra.mxu0 %v3941_v13  ;;  %388 = vst [vmem:[#allocation2 + $0xe8] sm:$0xf] %v328_v2  ;;  %v621_v3 = vsel %vm3312_vm2, %v619_v36, %v620_v7  ;;  %v331_v47 = vsel %vm3537_vm9, %v329_v5, %v330_v50  ;;  %v332_v29 = vrot.slane %v330_v50, 4  ;;  %v626_v16 = vrot.slane %v3896_v39, 6  ;;  %1585 = vmatmul.mubr.bf16.gmra.mrb[44].mxu1 %v1158_v58  ;;  %v4814_v54 = vld [vmem:[#allocation10_spill] sm:$0xff]  ;;  %v4815_v9 = vld [vmem:[#allocation4_spill] sm:$0xff] }
  0xa9   :  { %2371 = vmatprep.subr.bf16.mxu0 %v4037_v51  ;;  %687 = vst [vmem:[#allocation2 + $0xbc] sm:$0xf] %v621_v3  ;;  %389 = vst [vmem:[#allocation2 + $0xf4] sm:$0xf] %v331_v47  ;;  %v624_v25 = vsel %vm3312_vm2, %v622_v56, %v623_v63  ;;  %v625_v62 = vrot.slane %v623_v63, 4  ;;  %v629_v13 = vrot.slane %v3903_v14, 6  ;;  %1594 = vmatprep.mubr.bf16.mxu1 %v1159_v1 }
  0xaa   :  { %v4811_v45 = vrot.slane %v4810_v24, 7  ;;  %688 = vst [vmem:[#allocation2 + $0xc8] sm:$0xf] %v624_v25  ;;  %v632_v51 = vrot.slane %v4812_v40, 6  ;;  %v635_v30 = vrot.slane %v4813_v18, 6  ;;  %v628_v14 = vrot.slane %v626_v16, 4 }
  0xab   :  { %2255 = vmatmul.mubr.bf16.gmra.mrb[8].mxu0 %v3124_v21  ;;  %v627_v39 = vsel %vm3312_vm2, %v625_v62, %v626_v16  ;;  %v631_v23 = vrot.slane %v629_v13, 4  ;;  %v4816_v53 = vrot.slane %v4815_v9, 6  ;;  %v4817_v48 = vld [vmem:[#allocation12_spill] sm:$0xff]  ;;  %v4818_v1 = vld [vmem:[#allocation5_spill] sm:$0xff]  ;;  %v4819_v52 = vld [vmem:[#allocation3_spill] sm:$0xff] }
  0xac   :  { %v334_v10 = vsel %vm3537_vm9, %v332_v29, %v4811_v45  ;;  %2264 = vmatprep.mubr.bf16.mxu0 %v3128_v20  ;;  %2372 = vmatpush1.bf16.msra.mxu0 %v4814_v54  ;;  %689 = vst [vmem:[#allocation2 + $0xd4] sm:$0xf] %v627_v39  ;;  %v634_v4 = vrot.slane %v632_v51, 4  ;;  %v637_v15 = vrot.slane %v635_v30, 4  ;;  %v630_v60 = vsel %vm3312_vm2, %v628_v14, %v629_v13  ;;  %v3130_v28 = vld [vmem:[#allocation2 + $0x48] ss:$12 sps:$4 sm:$0xff]  }
  0xad   :  { %390 = vst [vmem:[#allocation2 + $0x100] sm:$0xf] %v334_v10  ;;  %v580_v57 = vrot.slane %v4816_v53, 4  ;;  %2373 = vmatprep.subr.bf16.mxu0 %v4817_v48  ;;  %v581_v46 = vrot.slane %v4818_v1, 6  ;;  %v633_v61 = vsel %vm3312_vm2, %v631_v23, %v632_v51  ;;  %690 = vst [vmem:[#allocation2 + $0xe0] sm:$0xf] %v630_v60 }
  0xae   :  { %v636_v58 = vsel %vm3312_vm2, %v634_v4, %v635_v30  ;;  %v4820_v22 = vrot.slane %v4819_v52, 6  ;;  %v3131_v26 = vld [vmem:[#allocation2 + $0x64] ss:$12 sps:$4 sm:$0xff]   ;;  %691 = vst [vmem:[#allocation2 + $0xec] sm:$0xf] %v633_v61  ;;  %v766_v20 = vld [vmem:[#allocation2 + $0x108] sm:$0xff] }
  0xaf   :  { %692 = vst [vmem:[#allocation2 + $0xf8] sm:$0xf] %v636_v58  ;;  %v582_v44 = vsel %vm3312_vm2, %v580_v57, %v581_v46  ;;  %v583_v19 = vrot.slane %v581_v46, 4  ;;  %v4821_v49 = vld [vmem:[#allocation11_spill] sm:$0xff]  ;;  %v4822_v42 = vld [vmem:[#allocation6_spill] sm:$0xff]  ;;  %v3176_v56 = vld [vmem:[#allocation2 + $0x114] sm:$0xff] }
  0xb0   :  { %v639_v12 = vsel %vm3312_vm2, %v637_v15, %v4820_v22  ;;  %2374 = vmatpush1.bf16.msra.mxu0 %v4821_v49  ;;  %674 = vst [vmem:[#allocation2 + $0x20] sm:$0xf] %v582_v44  ;;  %v4823_v37 = vrot.slane %v4822_v42, 6  ;;  %1595 = vmatmul.mubr.bf16.gmra.mrb[48].mxu1 %v1157_v17  ;;  %v3134_v41 = vld [vmem:[#allocation2 + $0x38] ss:$12 sps:$4 sm:$0xff]   ;;  %v2702_v63 = vcombine.high %v766_v20, %v3176_v56 }
  0xb1   :  { %693 = vst [vmem:[#allocation2 + $0x104] sm:$0xf] %v639_v12  ;;  %2375 = vmatprep.subr.bf16.mxu0 %v4235_v27  ;;  %2415 = vmatprep.mubr.bf16.mxu1 %v4794_v43  ;;  %v3133_v33 = vld [vmem:[#allocation2 + $0x60] ss:$12 sps:$4 sm:$0xff]   ;;  %v3135_v27 = vld [vmem:[#allocation2 + $0x7c] ss:$12 sps:$4 sm:$0xff]   ;;  %v2701_v47 = vcombine.low %v766_v20, %v3176_v56 }
  0xb2   :  { %v585_v0 = vsel %vm3312_vm2, %v583_v19, %v4823_v37  ;;  %v3138_v6 = vld [vmem:[#allocation2 + $0x50] ss:$12 sps:$4 sm:$0xff]   ;;  %v3139_v17 = vld [vmem:[#allocation2 + $0x94] ss:$12 sps:$4 sm:$0xff]   ;;  %v3150_v21 = vld [vmem:[#allocation2 + $0x98] ss:$12 sps:$4 sm:$0xff]  }
  0xb3   :  { %2265 = vmatmul.mubr.bf16.gmra.mrb[12].mxu0 %v3130_v28  ;;  %675 = vst [vmem:[#allocation2 + $0x2c] sm:$0xf] %v585_v0  ;;  %v3142_v35 = vld [vmem:[#allocation2 + $0x68] ss:$12 sps:$4 sm:$0xff]   ;;  %v3146_v55 = vld [vmem:[#allocation2 + $0x80] ss:$12 sps:$4 sm:$0xff]  }
  0xb4   :  { %2274 = vmatprep.mubr.bf16.mxu0 %v3131_v26  ;;  %2376 = vmatpush1.bf16.msra.mxu0 %v4227_v11  ;;  %v3141_v11 = vld [vmem:[#allocation2 + $0x90] ss:$12 sps:$4 sm:$0xff]   ;;  %v3149_v7 = vld [vmem:[#allocation2 + $0xc0] ss:$12 sps:$4 sm:$0xff]   ;;  %v3153_v36 = vld [vmem:[#allocation2 + $0xd8] ss:$12 sps:$4 sm:$0xff]  }
  0xb5   :  { %2377 = vmatprep.subr.bf16.mxu0 %v4265_v31  ;;  %v3143_v31 = vld [vmem:[#allocation2 + $0xac] ss:$12 sps:$4 sm:$0xff]   ;;  %v3147_v34 = vld [vmem:[#allocation2 + $0xc4] ss:$12 sps:$4 sm:$0xff]   ;;  %v3151_v32 = vld [vmem:[#allocation2 + $0xdc] ss:$12 sps:$4 sm:$0xff]  }
  0xb6   :  { %v3154_v5 = vld [vmem:[#allocation2 + $0xb0] ss:$12 sps:$4 sm:$0xff]   ;;  %v3155_v50 = vld [vmem:[#allocation2 + $0xf4] ss:$12 sps:$4 sm:$0xff]  }
  0xb7   :  { %v3157_v2 = vld [vmem:[#allocation2 + $0xf0] ss:$12 sps:$4 sm:$0xff]   ;;  %v3158_v8 = vld [vmem:[#allocation2 + $0xc8] ss:$12 sps:$4 sm:$0xff]   ;;  %v770_v3 = vld [vmem:[#allocation2 + $0x120] sm:$0x33] }
  0xb8   :  { %2378 = vmatpush1.bf16.msra.mxu0 %v4250_v59  ;;  %2416 = vmatmul.mubr.bf16.vlgmr.msra.gmra.mrb[52].mxu1 %v3134_v41  ;;  %v3145_v59 = vld [vmem:[#allocation2 + $0xa8] ss:$12 sps:$4 sm:$0xff]   ;;  %v3161_v29 = vld [vmem:[#allocation2 + $0xe0] ss:$12 sps:$4 sm:$0xff]   ;;  %v2705_v25 = vcombine.high %v770_v3, %v770_v3  ;;  %v2704_v62 = vcombine.low %v770_v3, %v770_v3  ;;  %v3164_v16 = vld [vmem:[#allocation2 + $0xf8] ss:$12 sps:$4 sm:$0xff]  }
  0xb9   :  { %2425 = vmatprep.mubr.bf16.mxu1 %v4794_v43  ;;  %v767_v13 = vld [vmem:[#allocation2 + $0x110] sm:$0xf]  ;;  %v3165_v24 = vld [vmem:[#allocation2 + $0x8] ss:$12 sps:$4 sm:$0xff]   ;;  %v3177_v45 = vld [vmem:[#allocation2 + $0x11c] sm:$0xf] }
  0xba   :  { %v2703_v10 = vcombine.low %v767_v13, %v3177_v45  ;;  %v3166_v40 = vld [vmem:[#allocation2 + $0x20] ss:$12 sps:$4 sm:$0xff]   ;;  %v3167_v51 = vld [vmem:[#allocation2 + $0x128] ss:$0 sps:$4 sm:$0x33]  }
  0xbb   :  { %2275 = vmatmul.mubr.bf16.gmra.mrb[16].mxu0 %v3133_v33 }
  0xbc   :  { %2284 = vmatprep.mubr.bf16.mxu0 %v3135_v27 }
  0xc0   :  { %2426 = vmatmul.mubr.bf16.gmra.mrb[56].mxu1 %v3138_v6 }
  0xc1   :  { %2435 = vmatprep.mubr.bf16.mxu1 %v4794_v43 }
  0xc3   :  { %2285 = vmatmul.mubr.bf16.gmra.mrb[20].mxu0 %v3137_v38 }
  0xc4   :  { %2294 = vmatprep.mubr.bf16.mxu0 %v3139_v17 }
  0xc8   :  { %2436 = vmatmul.mubr.bf16.gmra.mrb[60].mxu1 %v3142_v35 }
  0xc9   :  { %2445 = vmatprep.mubr.bf16.mxu1 %v4794_v43 }
  0xcb   :  { %2295 = vmatmul.mubr.bf16.gmra.mrb[24].mxu0 %v3141_v11 }
  0xcc   :  { %2304 = vmatprep.mubr.bf16.mxu0 %v3143_v31 }
  0xd0   :  { %2446 = vmatmul.mubr.bf16.gmra.mrb[64].mxu1 %v3146_v55 }
  0xd1   :  { %2455 = vmatprep.mubr.bf16.mxu1 %v4794_v43 }
  0xd3   :  { %2305 = vmatmul.mubr.bf16.gmra.mrb[28].mxu0 %v3145_v59 }
  0xd4   :  { %2314 = vmatprep.mubr.bf16.mxu0 %v3147_v34 }
  0xd8   :  { %2456 = vmatmul.mubr.bf16.gmra.mrb[68].mxu1 %v3150_v21 }
  0xd9   :  { %2465 = vmatprep.mubr.bf16.mxu1 %v4794_v43 }
  0xdb   :  { %2315 = vmatmul.mubr.bf16.gmra.mrb[32].mxu0 %v3149_v7 }
  0xdc   :  { %2324 = vmatprep.mubr.bf16.mxu0 %v3151_v32 }
  0xe0   :  { %2466 = vmatmul.mubr.bf16.gmra.mrb[72].mxu1 %v3154_v5 }
  0xe1   :  { %2475 = vmatprep.mubr.bf16.mxu1 %v4794_v43 }
  0xe3   :  { %2325 = vmatmul.mubr.bf16.gmra.mrb[36].mxu0 %v3153_v36 }
  0xe4   :  { %2334 = vmatprep.mubr.bf16.mxu0 %v3155_v50 }
  0xe8   :  { %2476 = vmatmul.mubr.bf16.gmra.mrb[76].mxu1 %v3158_v8 }
  0xe9   :  { %2485 = vmatprep.mubr.bf16.mxu1 %v4794_v43 }
  0xeb   :  { %2335 = vmatmul.mubr.bf16.gmra.mrb[40].mxu0 %v3157_v2 }
  0xec   :  { %2344 = vmatprep.mubr.bf16.mxu0 %v2702_v63 }
  0xf0   :  { %2486 = vmatmul.mubr.bf16.gmra.mrb[80].mxu1 %v3161_v29 }
  0xf1   :  { %2495 = vmatprep.mubr.bf16.mxu1 %v4794_v43 }
  0xf3   :  { %2345 = vmatmul.mubr.bf16.gmra.mrb[44].mxu0 %v2701_v47 }
  0xf4   :  { %2354 = vmatprep.mubr.bf16.mxu0 %v2705_v25 }
  0xf8   :  { %2496 = vmatmul.mubr.bf16.gmra.mrb[84].mxu1 %v3164_v16 }
  0xf9   :  { %2505 = vmatprep.mubr.bf16.mxu1 %v4794_v43 }
  0xfb   :  { %2355 = vmatmul.mubr.bf16.gmra.mrb[48].mxu0 %v2704_v62 }
  0xfc   :  { %2395 = vmatprep.mubr.bf16.mxu0 %v4794_v43 }
 0x100   :  { %2506 = vmatmul.mubr.bf16.gmra.mrb[88].mxu1 %v2703_v10 }
 0x101   :  { %2515 = vmatprep.mubr.bf16.mxu1 %v4794_v43 }
 0x103   :  { %2396 = vmatmul.mubr.bf16.vlgmr.msra.gmra.mrb[0].mxu0 %v3165_v24 }
 0x104   :  { %2405 = vmatprep.mubr.bf16.mxu0 %v4794_v43 }
 0x108   :  { %2516 = vmatmul.mubr.bf16.gmra.mrb[92].mxu1 %v3167_v51 }
 0x10b   :  { %2406 = vmatmul.mubr.bf16.gmra.mrb[4].mxu0 %v3166_v40 }
 0x118   :  { %v4484_v18 = vpop.f32.mrb[0].mxu1 }
 0x119   :  { %v4486_v30 = vpop.f32.mrb[1].mxu1 }
 0x11a   :  { %v4488_v39 = vpop.f32.mrb[2].mxu1 }
 0x11b   :  { %v4490_v14 = vpop.f32.mrb[3].mxu1 }
 0x11c   :  { %4824 = vst [vmem:[#allocation7_spill] sm:$0xff] %v4490_v14 }
 0x120   :  { %v4492_v54 = vpop.f32.mrb[4].mxu1 }
 0x121   :  { %4825 = vst [vmem:[#allocation8_spill] sm:$0xff] %v4492_v54  ;;  %v4494_v23 = vpop.f32.mrb[5].mxu1 }
 0x122   :  { %4826 = vst [vmem:[#allocation9_spill] sm:$0xff] %v4494_v23  ;;  %v4496_v4 = vpop.f32.mrb[6].mxu1 }
 0x123   :  { %4827 = vst [vmem:[#allocation10_spill] sm:$0xff] %v4496_v4  ;;  %v4498_v15 = vpop.f32.mrb[7].mxu1 }
 0x124   :  { %4828 = vst [vmem:[#allocation4_spill] sm:$0xff] %v4498_v15 }
 0x128   :  { %v1496_v43 = vpop.f32.mrb[8].mxu1 }
 0x129   :  { %v1498_v9 = vpop.f32.mrb[9].mxu1 }
 0x12a   :  { %v1500_v53 = vpop.f32.mrb[10].mxu1 }
 0x12b   :  { %v1502_v57 = vpop.f32.mrb[11].mxu1 }
 0x130   :  { %v1506_v48 = vpop.f32.mrb[12].mxu1 }
 0x131   :  { %v1508_v60 = vpop.f32.mrb[13].mxu1 }
 0x132   :  { %v1510_v1 = vpop.f32.mrb[14].mxu1 }
 0x133   :  { %v1512_v46 = vpop.f32.mrb[15].mxu1 }
 0x13a   :  { %v1516_v28 = vpop.f32.mrb[16].mxu1 }
 0x13b   :  { %v1518_v61 = vpop.f32.mrb[17].mxu1 }
 0x13c   :  { %v1520_v58 = vpop.f32.mrb[18].mxu1 }
 0x13d   :  { %v4500_v52 = vpop.f32.mrb[19].mxu1 }
 0x144   :  { %v4502_v22 = vpop.f32.mrb[20].mxu1 }
 0x145   :  { %v4504_v12 = vpop.f32.mrb[21].mxu1 }
 0x146   :  { %v4506_v26 = vpop.f32.mrb[22].mxu1 }
 0x147   :  { %v4508_v44 = vpop.f32.mrb[23].mxu1 }
 0x14f   :  { %v4510_v19 = vpop.f32.mrb[24].mxu1 }
 0x150   :  { %v4512_v49 = vpop.f32.mrb[25].mxu1 }
 0x151   :  { %v4514_v42 = vpop.f32.mrb[26].mxu1 }
 0x152   :  { %v4516_v37 = vpop.f32.mrb[27].mxu1 }
 0x159   :  { %v4518_v0 = vpop.f32.mrb[28].mxu1 }
 0x15a   :  { %v4520_v41 = vpop.f32.mrb[29].mxu1 }
 0x15b   :  { %v4522_v33 = vpop.f32.mrb[30].mxu1 }
 0x15c   :  { %v4524_v27 = vpop.f32.mrb[31].mxu1 }
 0x163   :  { %v4526_v38 = vpop.f32.mrb[32].mxu1 }
 0x164   :  { %v4528_v6 = vpop.f32.mrb[33].mxu1 }
 0x165   :  { %v4530_v17 = vpop.f32.mrb[34].mxu1 }
 0x166   :  { %v4532_v11 = vpop.f32.mrb[35].mxu1 }
 0x16b   :  { %v4534_v35 = vpop.f32.mrb[36].mxu1 }
 0x16c   :  { %v4536_v31 = vpop.f32.mrb[37].mxu1 }
 0x16d   :  { %v4538_v59 = vpop.f32.mrb[38].mxu1 }
 0x16e   :  { %v4540_v55 = vpop.f32.mrb[39].mxu1 }
 0x173   :  { %v4542_v34 = vpop.f32.mrb[40].mxu1 }
 0x174   :  { %v4544_v7 = vpop.f32.mrb[41].mxu1 }
 0x175   :  { %v4546_v21 = vpop.f32.mrb[42].mxu1 }
 0x176   :  { %v4548_v32 = vpop.f32.mrb[43].mxu1 }
 0x17b   :  { %v4550_v36 = vpop.f32.mrb[44].mxu1 }
 0x17c   :  { %v4552_v20 = vpop.f32.mrb[45].mxu1 }
 0x17d   :  { %v4554_v56 = vpop.f32.mrb[46].mxu1 }
 0x17e   :  { %v2256_v5 = vpop.f32.mrb[8].mxu0  ;;  %v4556_v47 = vpop.f32.mrb[47].mxu1 }
 0x17f   :  { %v2779_v50 = vadd.f32 %v2256_v5, %v1496_v43  ;;  %v2258_v2 = vpop.f32.mrb[9].mxu0 }
 0x180   :  { %v2781_v8 = vadd.f32 %v2258_v2, %v1498_v9  ;;  %v2260_v63 = vpop.f32.mrb[10].mxu0 }
 0x181   :  { %v2783_v3 = vadd.f32 %v2260_v63, %v1500_v53  ;;  %v2262_v29 = vpop.f32.mrb[11].mxu0 }
 0x182   :  { %v2785_v25 = vadd.f32 %v2262_v29, %v1502_v57 }
 0x183   :  { %v4558_v62 = vpop.f32.mrb[48].mxu1 }
 0x184   :  { %v4560_v24 = vpop.f32.mrb[49].mxu1 }
 0x185   :  { %v1600_v40 = vpop.f32.mrb[50].mxu1 }
 0x186   :  { %v2266_v16 = vpop.f32.mrb[12].mxu0  ;;  %v1601_v9 = vpop.f32.mrb[51].mxu1 }
 0x187   :  { %v2787_v13 = vadd.f32 %v2266_v16, %v1506_v48  ;;  %v2268_v45 = vpop.f32.mrb[13].mxu0 }
 0x188   :  { %v2789_v10 = vadd.f32 %v2268_v45, %v1508_v60  ;;  %v2270_v51 = vpop.f32.mrb[14].mxu0 }
 0x189   :  { %v2791_v43 = vadd.f32 %v2270_v51, %v1510_v1  ;;  %v2272_v5 = vpop.f32.mrb[15].mxu0 }
 0x18a   :  { %v2793_v2 = vadd.f32 %v2272_v5, %v1512_v46 }
 0x18b   :  { %v2417_v53 = vpop.f32.mrb[52].mxu1 }
 0x18c   :  { %v2780_v4 = vadd.f32 %v2779_v50, %v2417_v53  ;;  %v2419_v57 = vpop.f32.mrb[53].mxu1 }
 0x18d   :  { %v2782_v54 = vadd.f32 %v2781_v8, %v2419_v57  ;;  %v2421_v48 = vpop.f32.mrb[54].mxu1 }
 0x18e   :  { %v2276_v15 = vpop.f32.mrb[16].mxu0  ;;  %2532 = vst [vmem:[%s4753_s2 + $0x40] sm:$0xff] %v2780_v4  ;;  %v2784_v16 = vadd.f32 %v2783_v3, %v2421_v48  ;;  %v2423_v45 = vpop.f32.mrb[55].mxu1 }
 0x18f   :  { %v2795_v63 = vadd.f32 %v2276_v15, %v1516_v28  ;;  %v2278_v23 = vpop.f32.mrb[17].mxu0  ;;  %2533 = vst [vmem:[%s4753_s2 + $0x48] sm:$0xff] %v2782_v54  ;;  %v2786_v46 = vadd.f32 %v2785_v25, %v2423_v45 }
 0x190   :  { %v2797_v29 = vadd.f32 %v2278_v23, %v1518_v61  ;;  %v2280_v14 = vpop.f32.mrb[18].mxu0  ;;  %2534 = vst [vmem:[%s4753_s2 + $0x50] sm:$0xff] %v2784_v16 }
 0x191   :  { %v2799_v60 = vadd.f32 %v2280_v14, %v1520_v58  ;;  %v2282_v1 = vpop.f32.mrb[19].mxu0  ;;  %2535 = vst [vmem:[%s4753_s2 + $0x58] sm:$0xff] %v2786_v46 }
 0x192   :  { %v2801_v15 = vadd.f32 %v2282_v1, %v4500_v52 }
 0x193   :  { %v2427_v14 = vpop.f32.mrb[56].mxu1 }
 0x194   :  { %v2788_v28 = vadd.f32 %v2787_v13, %v2427_v14  ;;  %v2429_v58 = vpop.f32.mrb[57].mxu1 }
 0x195   :  { %v2790_v50 = vadd.f32 %v2789_v10, %v2429_v58  ;;  %v2431_v8 = vpop.f32.mrb[58].mxu1 }
 0x196   :  { %v2286_v23 = vpop.f32.mrb[20].mxu0  ;;  %2536 = vst [vmem:[%s4753_s2 + $0x60] sm:$0xff] %v2788_v28  ;;  %v2792_v25 = vadd.f32 %v2791_v43, %v2431_v8  ;;  %v2433_v51 = vpop.f32.mrb[59].mxu1 }
 0x197   :  { %v2803_v4 = vadd.f32 %v2286_v23, %v4502_v22  ;;  %v2288_v61 = vpop.f32.mrb[21].mxu0  ;;  %2537 = vst [vmem:[%s4753_s2 + $0x68] sm:$0xff] %v2790_v50  ;;  %v2794_v13 = vadd.f32 %v2793_v2, %v2433_v51 }
 0x198   :  { %v2805_v54 = vadd.f32 %v2288_v61, %v4504_v12  ;;  %v2290_v52 = vpop.f32.mrb[22].mxu0  ;;  %2538 = vst [vmem:[%s4753_s2 + $0x70] sm:$0xff] %v2792_v25 }
 0x199   :  { %v2807_v3 = vadd.f32 %v2290_v52, %v4506_v26  ;;  %v2292_v40 = vpop.f32.mrb[23].mxu0  ;;  %2539 = vst [vmem:[%s4753_s2 + $0x78] sm:$0xff] %v2794_v13 }
 0x19a   :  { %v2809_v22 = vadd.f32 %v2292_v40, %v4508_v44 }
 0x19b   :  { %v2437_v26 = vpop.f32.mrb[60].mxu1 }
 0x19c   :  { %v2796_v43 = vadd.f32 %v2795_v63, %v2437_v26  ;;  %v2439_v5 = vpop.f32.mrb[61].mxu1 }
 0x19d   :  { %v2798_v57 = vadd.f32 %v2797_v29, %v2439_v5  ;;  %v2441_v2 = vpop.f32.mrb[62].mxu1 }
 0x19e   :  { %v2296_v12 = vpop.f32.mrb[24].mxu0  ;;  %2540 = vst [vmem:[%s4753_s2 + $0x80] sm:$0xff] %v2796_v43  ;;  %v2800_v16 = vadd.f32 %v2799_v60, %v2441_v2  ;;  %v2443_v45 = vpop.f32.mrb[63].mxu1 }
 0x19f   :  { %v2811_v10 = vadd.f32 %v2296_v12, %v4510_v19  ;;  %v2298_v9 = vpop.f32.mrb[25].mxu0  ;;  %2541 = vst [vmem:[%s4753_s2 + $0x88] sm:$0xff] %v2798_v57  ;;  %v2802_v63 = vadd.f32 %v2801_v15, %v2443_v45 }
 0x1a0   :  { %v2813_v53 = vadd.f32 %v2298_v9, %v4512_v49  ;;  %v2300_v44 = vpop.f32.mrb[26].mxu0  ;;  %2542 = vst [vmem:[%s4753_s2 + $0x90] sm:$0xff] %v2800_v16 }
 0x1a1   :  { %v2815_v48 = vadd.f32 %v2300_v44, %v4514_v42  ;;  %v2302_v1 = vpop.f32.mrb[27].mxu0  ;;  %2543 = vst [vmem:[%s4753_s2 + $0x98] sm:$0xff] %v2802_v63 }
 0x1a2   :  { %v2817_v19 = vadd.f32 %v2302_v1, %v4516_v37 }
 0x1a3   :  { %v2447_v42 = vpop.f32.mrb[64].mxu1 }
 0x1a4   :  { %v2804_v60 = vadd.f32 %v2803_v4, %v2447_v42  ;;  %v2449_v23 = vpop.f32.mrb[65].mxu1 }
 0x1a5   :  { %v2806_v28 = vadd.f32 %v2805_v54, %v2449_v23  ;;  %v2451_v15 = vpop.f32.mrb[66].mxu1 }
 0x1a6   :  { %v2306_v49 = vpop.f32.mrb[28].mxu0  ;;  %2544 = vst [vmem:[%s4753_s2 + $0xa0] sm:$0xff] %v2804_v60  ;;  %v2808_v58 = vadd.f32 %v2807_v3, %v2451_v15  ;;  %v2453_v52 = vpop.f32.mrb[67].mxu1 }
 0x1a7   :  { %v2819_v29 = vadd.f32 %v2306_v49, %v4518_v0  ;;  %v2308_v46 = vpop.f32.mrb[29].mxu0  ;;  %2545 = vst [vmem:[%s4753_s2 + $0xa8] sm:$0xff] %v2806_v28  ;;  %v2810_v4 = vadd.f32 %v2809_v22, %v2453_v52 }
 0x1a8   :  { %v2821_v14 = vadd.f32 %v2308_v46, %v4520_v41  ;;  %v2310_v37 = vpop.f32.mrb[30].mxu0  ;;  %2546 = vst [vmem:[%s4753_s2 + $0xb0] sm:$0xff] %v2808_v58 }
 0x1a9   :  { %v2823_v61 = vadd.f32 %v2310_v37, %v4522_v33  ;;  %v2312_v50 = vpop.f32.mrb[31].mxu0  ;;  %2547 = vst [vmem:[%s4753_s2 + $0xb8] sm:$0xff] %v2810_v4 }
 0x1aa   :  { %v2825_v0 = vadd.f32 %v2312_v50, %v4524_v27 }
 0x1ab   :  { %v2457_v33 = vpop.f32.mrb[68].mxu1 }
 0x1ac   :  { %v2812_v8 = vadd.f32 %v2811_v10, %v2457_v33  ;;  %v2459_v25 = vpop.f32.mrb[69].mxu1 }
 0x1ad   :  { %v2814_v51 = vadd.f32 %v2813_v53, %v2459_v25  ;;  %v2461_v22 = vpop.f32.mrb[70].mxu1 }
 0x1ae   :  { %v2316_v41 = vpop.f32.mrb[32].mxu0  ;;  %2548 = vst [vmem:[%s4753_s2 + $0xc0] sm:$0xff] %v2812_v8  ;;  %v2816_v12 = vadd.f32 %v2815_v48, %v2461_v22  ;;  %v2463_v43 = vpop.f32.mrb[71].mxu1 }
 0x1af   :  { %v2827_v54 = vadd.f32 %v2316_v41, %v4526_v38  ;;  %v2318_v3 = vpop.f32.mrb[33].mxu0  ;;  %2549 = vst [vmem:[%s4753_s2 + $0xc8] sm:$0xff] %v2814_v51  ;;  %v2818_v10 = vadd.f32 %v2817_v19, %v2463_v43 }
 0x1b0   :  { %v2829_v40 = vadd.f32 %v2318_v3, %v4528_v6  ;;  %v2320_v27 = vpop.f32.mrb[34].mxu0  ;;  %2550 = vst [vmem:[%s4753_s2 + $0xd0] sm:$0xff] %v2816_v12 }
 0x1b1   :  { %v2831_v13 = vadd.f32 %v2320_v27, %v4530_v17  ;;  %v2322_v26 = vpop.f32.mrb[35].mxu0  ;;  %2551 = vst [vmem:[%s4753_s2 + $0xd8] sm:$0xff] %v2818_v10 }
 0x1b2   :  { %v2833_v38 = vadd.f32 %v2322_v26, %v4532_v11 }
 0x1b3   :  { %v2467_v17 = vpop.f32.mrb[72].mxu1 }
 0x1b4   :  { %v2820_v5 = vadd.f32 %v2819_v29, %v2467_v17  ;;  %v2469_v57 = vpop.f32.mrb[73].mxu1 }
 0x1b5   :  { %v2822_v2 = vadd.f32 %v2821_v14, %v2469_v57  ;;  %v2471_v48 = vpop.f32.mrb[74].mxu1 }
 0x1b6   :  { %v2326_v6 = vpop.f32.mrb[36].mxu0  ;;  %2552 = vst [vmem:[%s4753_s2 + $0xe0] sm:$0xff] %v2820_v5  ;;  %v2824_v1 = vadd.f32 %v2823_v61, %v2471_v48  ;;  %v2473_v19 = vpop.f32.mrb[75].mxu1 }
 0x1b7   :  { %v2835_v9 = vadd.f32 %v2326_v6, %v4534_v35  ;;  %v2328_v53 = vpop.f32.mrb[37].mxu0  ;;  %2553 = vst [vmem:[%s4753_s2 + $0xe8] sm:$0xff] %v2822_v2  ;;  %v2826_v63 = vadd.f32 %v2825_v0, %v2473_v19 }
 0x1b8   :  { %v2837_v44 = vadd.f32 %v2328_v53, %v4536_v31  ;;  %v2330_v11 = vpop.f32.mrb[38].mxu0  ;;  %2554 = vst [vmem:[%s4753_s2 + $0xf0] sm:$0xff] %v2824_v1 }
 0x1b9   :  { %v2839_v16 = vadd.f32 %v2330_v11, %v4538_v59  ;;  %v2332_v45 = vpop.f32.mrb[39].mxu0  ;;  %2555 = vst [vmem:[%s4753_s2 + $0xf8] sm:$0xff] %v2826_v63 }
 0x1ba   :  { %v2841_v35 = vadd.f32 %v2332_v45, %v4540_v55 }
 0x1bb   :  { %v2477_v59 = vpop.f32.mrb[76].mxu1 }
 0x1bc   :  { %v2828_v42 = vadd.f32 %v2827_v54, %v2477_v59  ;;  %v2479_v60 = vpop.f32.mrb[77].mxu1  ;;  %v4830_v59 = vld [vmem:[#allocation8_spill] sm:$0xff] }
 0x1bd   :  { %v2830_v23 = vadd.f32 %v2829_v40, %v2479_v60  ;;  %v2481_v14 = vpop.f32.mrb[78].mxu1 }
 0x1be   :  { %v2336_v31 = vpop.f32.mrb[40].mxu0  ;;  %2556 = vst [vmem:[%s4753_s2 + $0x100] sm:$0xff] %v2828_v42  ;;  %v2832_v37 = vadd.f32 %v2831_v13, %v2481_v14  ;;  %v2483_v61 = vpop.f32.mrb[79].mxu1 }
 0x1bf   :  { %v2843_v49 = vadd.f32 %v2336_v31, %v4542_v34  ;;  %v2338_v29 = vpop.f32.mrb[41].mxu0  ;;  %2557 = vst [vmem:[%s4753_s2 + $0x108] sm:$0xff] %v2830_v23  ;;  %v2834_v58 = vadd.f32 %v2833_v38, %v2483_v61 }
 0x1c0   :  { %v2845_v46 = vadd.f32 %v2338_v29, %v4544_v7  ;;  %v2340_v55 = vpop.f32.mrb[42].mxu0  ;;  %2558 = vst [vmem:[%s4753_s2 + $0x110] sm:$0xff] %v2832_v37  ;;  %v4832_v37 = vld [vmem:[#allocation10_spill] sm:$0xff] }
 0x1c1   :  { %v2847_v28 = vadd.f32 %v2340_v55, %v4546_v21  ;;  %v2342_v15 = vpop.f32.mrb[43].mxu0  ;;  %2559 = vst [vmem:[%s4753_s2 + $0x118] sm:$0xff] %v2834_v58  ;;  %v4833_v58 = vld [vmem:[#allocation4_spill] sm:$0xff] }
 0x1c2   :  { %v2849_v34 = vadd.f32 %v2342_v15, %v4548_v32 }
 0x1c3   :  { %v2487_v21 = vpop.f32.mrb[80].mxu1 }
 0x1c4   :  { %v2836_v52 = vadd.f32 %v2835_v9, %v2487_v21  ;;  %v2489_v4 = vpop.f32.mrb[81].mxu1 }
 0x1c5   :  { %v2838_v33 = vadd.f32 %v2837_v44, %v2489_v4  ;;  %v2491_v54 = vpop.f32.mrb[82].mxu1 }
 0x1c6   :  { %v2346_v7 = vpop.f32.mrb[44].mxu0  ;;  %2560 = vst [vmem:[%s4753_s2 + $0x120] sm:$0xff] %v2836_v52  ;;  %v2840_v3 = vadd.f32 %v2839_v16, %v2491_v54  ;;  %v2493_v40 = vpop.f32.mrb[83].mxu1 }
 0x1c7   :  { %v2851_v50 = vadd.f32 %v2346_v7, %v4550_v36  ;;  %v2348_v0 = vpop.f32.mrb[45].mxu0  ;;  %2561 = vst [vmem:[%s4753_s2 + $0x128] sm:$0xff] %v2838_v33  ;;  %v2842_v51 = vadd.f32 %v2841_v35, %v2493_v40 }
 0x1c8   :  { %v2853_v41 = vadd.f32 %v2348_v0, %v4552_v20  ;;  %v2350_v32 = vpop.f32.mrb[46].mxu0  ;;  %2562 = vst [vmem:[%s4753_s2 + $0x130] sm:$0xff] %v2840_v3 }
 0x1c9   :  { %v2855_v8 = vadd.f32 %v2350_v32, %v4554_v56  ;;  %v2352_v25 = vpop.f32.mrb[47].mxu0  ;;  %2563 = vst [vmem:[%s4753_s2 + $0x138] sm:$0xff] %v2842_v51 }
 0x1ca   :  { %v2857_v36 = vadd.f32 %v2352_v25, %v4556_v47 }
 0x1cb   :  { %v2497_v56 = vpop.f32.mrb[84].mxu1 }
 0x1cc   :  { %v2844_v22 = vadd.f32 %v2843_v49, %v2497_v56  ;;  %v2499_v12 = vpop.f32.mrb[85].mxu1 }
 0x1cd   :  { %v2846_v43 = vadd.f32 %v2845_v46, %v2499_v12  ;;  %v2501_v38 = vpop.f32.mrb[86].mxu1  ;;  %v4831_v46 = vld [vmem:[#allocation9_spill] sm:$0xff] }
 0x1ce   :  { %v2356_v20 = vpop.f32.mrb[48].mxu0  ;;  %2564 = vst [vmem:[%s4753_s2 + $0x140] sm:$0xff] %v2844_v22  ;;  %v2848_v10 = vadd.f32 %v2847_v28, %v2501_v38  ;;  %v2503_v17 = vpop.f32.mrb[87].mxu1 }
 0x1cf   :  { %v2859_v27 = vadd.f32 %v2356_v20, %v4558_v62  ;;  %v2358_v13 = vpop.f32.mrb[49].mxu0  ;;  %2565 = vst [vmem:[%s4753_s2 + $0x148] sm:$0xff] %v2846_v43  ;;  %v2850_v62 = vadd.f32 %v2849_v34, %v2503_v17 }
 0x1d0   :  { %v2861_v26 = vadd.f32 %v2358_v13, %v4560_v24  ;;  %v2360_v47 = vpop.f32.mrb[50].mxu0  ;;  %2566 = vst [vmem:[%s4753_s2 + $0x150] sm:$0xff] %v2848_v10 }
 0x1d1   :  { %v2361_v6 = vpop.f32.mrb[51].mxu0  ;;  %2567 = vst [vmem:[%s4753_s2 + $0x158] sm:$0xff] %v2850_v62 }
 0x1d3   :  { %v2507_v9 = vpop.f32.mrb[88].mxu1 }
 0x1d4   :  { %v2852_v53 = vadd.f32 %v2851_v50, %v2507_v9  ;;  %v2509_v44 = vpop.f32.mrb[89].mxu1 }
 0x1d5   :  { %v2854_v11 = vadd.f32 %v2853_v41, %v2509_v44  ;;  %v2511_v16 = vpop.f32.mrb[90].mxu1 }
 0x1d6   :  { %v2397_v24 = vpop.f32.mrb[0].mxu0  ;;  %2568 = vst [vmem:[%s4753_s2 + $0x160] sm:$0xff] %v2852_v53  ;;  %v2856_v45 = vadd.f32 %v2855_v8, %v2511_v16  ;;  %v2513_v19 = vpop.f32.mrb[91].mxu1 }
 0x1d7   :  { %v2771_v5 = vadd.f32 %v2397_v24, %v4484_v18  ;;  %v2399_v57 = vpop.f32.mrb[1].mxu0  ;;  %2569 = vst [vmem:[%s4753_s2 + $0x168] sm:$0xff] %v2854_v11  ;;  %v2858_v63 = vadd.f32 %v2857_v36, %v2513_v19 }
 0x1d8   :  { %v2772_v2 = vadd.f32 %v2399_v57, %v4486_v30  ;;  %v2401_v48 = vpop.f32.mrb[2].mxu0  ;;  %v4829_v30 = vld [vmem:[#allocation7_spill] sm:$0xff]  ;;  %2570 = vst [vmem:[%s4753_s2 + $0x170] sm:$0xff] %v2856_v45 }
 0x1d9   :  { %2524 = vst [vmem:[%s4753_s2] sm:$0xff] %v2771_v5  ;;  %v2773_v1 = vadd.f32 %v2401_v48, %v4488_v39  ;;  %v2403_v18 = vpop.f32.mrb[3].mxu0  ;;  %2571 = vst [vmem:[%s4753_s2 + $0x178] sm:$0xff] %v2858_v63 }
 0x1da   :  { %2525 = vst [vmem:[%s4753_s2 + $0x8] sm:$0xff] %v2772_v2  ;;  %v2774_v35 = vadd.f32 %v2403_v18, %v4829_v30 }
 0x1db   :  { %2526 = vst [vmem:[%s4753_s2 + $0x10] sm:$0xff] %v2773_v1  ;;  %v2517_v31 = vpop.f32.mrb[92].mxu1 }
 0x1dc   :  { %2527 = vst [vmem:[%s4753_s2 + $0x18] sm:$0xff] %v2774_v35  ;;  %v2860_v42 = vadd.f32 %v2859_v27, %v2517_v31  ;;  %v2519_v60 = vpop.f32.mrb[93].mxu1 }
 0x1dd   :  { %v2862_v55 = vadd.f32 %v2861_v26, %v2519_v60  ;;  %v2521_v28 = vpop.f32.mrb[94].mxu1 }
 0x1de   :  { %v2407_v39 = vpop.f32.mrb[4].mxu0  ;;  %2572 = vst [vmem:[%s4753_s2 + $0x180] sm:$0xf] %v2860_v42  ;;  %v2522_v34 = vpop.f32.mrb[95].mxu1 }
 0x1df   :  { %v2775_v49 = vadd.f32 %v2407_v39, %v4830_v59  ;;  %v2409_v29 = vpop.f32.mrb[5].mxu0  ;;  %2573 = vst [vmem:[%s4753_s2 + $0x188] sm:$0xf] %v2862_v55 }
 0x1e0   :  { %v2776_v23 = vadd.f32 %v2409_v29, %v4831_v46  ;;  %v2411_v14 = vpop.f32.mrb[6].mxu0 }
 0x1e1   :  { %2528 = vst [vmem:[%s4753_s2 + $0x20] sm:$0xff] %v2775_v49  ;;  %v2777_v15 = vadd.f32 %v2411_v14, %v4832_v37  ;;  %v2413_v61 = vpop.f32.mrb[7].mxu0 }
 0x1e2   :  { %2529 = vst [vmem:[%s4753_s2 + $0x28] sm:$0xff] %v2776_v23  ;;  %v2778_v7 = vadd.f32 %v2413_v61, %v4833_v58 }
 0x1e3   :  { %2530 = vst [vmem:[%s4753_s2 + $0x30] sm:$0xff] %v2777_v15 }
 0x1e4   :  { %2531 = vst [vmem:[%s4753_s2 + $0x38] sm:$0xff] %v2778_v7 }

</bundles_post_ra>
